<compile_context>
chip_gen: v7x
topology: tpu7x:2x2x1
jax: 0.10.0
libtpu: 0.0.40
codegen_flags: <defaults>
</compile_context>

<pallas_src>
import functools
import math

import jax
import jax.numpy as jnp
from jax.experimental import pallas as pl
from jax.experimental.pallas import tpu as pltpu

EPS = 1e-5          # nn.LayerNorm default
NEG_MASK = -1e30    # finite stand-in for -inf


def _layer_norm(y, gamma, beta):
    mu = jnp.mean(y, axis=-1, keepdims=True)
    var = jnp.mean((y - mu) ** 2, axis=-1, keepdims=True)
    return (y - mu) * jax.lax.rsqrt(var + EPS) * gamma + beta


def fused_encoder_kernel(x_ref, maskb_ref,
                         wqkv_ref, bqkv_ref, wo_ref, bo_ref,
                         ln1w_ref, ln1b_ref, ln2w_ref, ln2b_ref,
                         wff1_ref, bff1_ref, wff2_ref, bff2_ref,
                         wagg_ref, bagg_ref,
                         wf_ref, bf_ref, wa_ref, ba_ref,
                         logits_ref, aggout_ref,
                         x_sc, agg_sc,
                         *, num_heads, matmul_dtype=jnp.bfloat16):
    nb = pl.program_id(1)

    @pl.when(nb == 0)
    def _init():
        x_sc[...] = x_ref[...]                    # activation becomes VMEM-resident
        agg_sc[...] = jnp.zeros_like(agg_sc)

    BT, S, E = x_sc.shape
    H = num_heads
    hd = E // H
    N = BT * S
    md = matmul_dtype

    def mm(a, b):
        # Both operands already carry the matmul dtype (weights packed at pack
        # time, activations cast once per tensor); astype is then a no-op.
        return jnp.dot(a.astype(md), b.astype(md),
                       preferred_element_type=jnp.float32)

    def mm_f32(a, b):           # head matmuls, run once on the last block
        return jnp.dot(a, b, preferred_element_type=jnp.float32)

    x2 = x_sc[...].reshape(N, E)                  # f32, major-dim merge only
    x2m = x2.astype(md)                           # single activation cast/block
    neg = maskb_ref[...]                          # (BT, 1, S) additive bias

    # --- fused QKV projection: one (N,E)x(E,3E) MXU push per block ---
    qkv = mm(x2m, wqkv_ref[0]) + bqkv_ref[0]      # (N, 3E) f32
    qkv3 = qkv.astype(md).reshape(BT, S, 3 * E)   # single cast, major-dim split

    # --- per-head attention (heads are small; score/PV einsums stay 1-batch-dim) ---
    scale = 1.0 / math.sqrt(hd)
    head_outs = []
    for h in range(H):                            # tiny static unroll
        qh = qkv3[:, :, h * hd:(h + 1) * hd]                    # (BT, S, hd)
        kh = qkv3[:, :, E + h * hd:E + (h + 1) * hd]
        vh = qkv3[:, :, 2 * E + h * hd:2 * E + (h + 1) * hd]
        s = jnp.einsum('bqd,bkd->bqk', qh, kh,
                       preferred_element_type=jnp.float32) * scale + neg
        s = s - jnp.max(s, axis=-1, keepdims=True)
        p = jnp.exp(s)
        p = p * pl.reciprocal(jnp.sum(p, axis=-1, keepdims=True), approx=True)
        head_outs.append(
            jnp.einsum('bqk,bkd->bqd', p.astype(md), vh,
                       preferred_element_type=jnp.float32))     # (BT, S, hd)

    # fused output projection: one (N,E)x(E,E) MXU push
    attn_cat = jnp.concatenate(head_outs, axis=-1).reshape(N, E)     # f32
    attn_o = mm(attn_cat.astype(md), wo_ref[0]) + bo_ref[0]          # (N, E)

    # residual + LayerNorm1
    h1 = _layer_norm(x2 + attn_o, ln1w_ref[0], ln1b_ref[0])
    h1m = h1.astype(md)

    # feed-forward: Linear(E, 4E) -> ReLU -> Linear(4E, E)
    f = jnp.maximum(mm(h1m, wff1_ref[0]) + bff1_ref[0], 0.0)
    f = mm(f.astype(md), wff2_ref[0]) + bff2_ref[0]

    # residual + LayerNorm2
    out2 = _layer_norm(h1 + f, ln2w_ref[0], ln2b_ref[0])
    out3 = out2.reshape(BT, S, E)
    x_sc[...] = out3                              # carried to the next block

    # per-block aggregate: mean over seq, then this block's aggregate_fc
    m = jnp.sum(out3, axis=1) * (1.0 / S)         # (BT, E)
    agg_sc[...] = agg_sc[...] + mm(m.astype(md), wagg_ref[0]) + bagg_ref[0]

    # fused head — written once, on the last block
    @pl.when(nb == pl.num_programs(1) - 1)
    def _finish():
        x_last = out3[:, S - 1, :]                               # static slice
        logits = mm_f32(x_last, wf_ref[...]) + bf_ref[...]       # (BT, item_num)
        logits_ref[...] = logits[:, None, :]
        agg_out = mm_f32(agg_sc[...], wa_ref[...]) + ba_ref[...]  # (BT, E)
        aggout_ref[...] = agg_out[:, None, :]


_BLOCK_WEIGHT_NAMES = ("wqkv", "bqkv", "wo", "bo",
                       "ln1w", "ln1b", "ln2w", "ln2b",
                       "wff1", "bff1", "wff2", "bff2", "wagg", "bagg")
_HEAD_WEIGHT_NAMES = ("wf", "bf", "wa", "ba")


def _stacked_block_spec(shape):
    rest = tuple(shape[1:])
    n = len(rest)
    return pl.BlockSpec((1,) + rest, lambda bi, nb, _n=n: (nb,) + (0,) * _n)


def _const_spec(shape):
    n = len(shape)
    return pl.BlockSpec(tuple(shape), lambda bi, nb, _n=n: (0,) * _n)


def _nbytes(a):
    return int(a.size) * jnp.dtype(a.dtype).itemsize


def run_fused_encoder(x0, mask_bias, packed, *, num_heads, batch_tile=None,
                      matmul_dtype=jnp.bfloat16):
    B, S, E = x0.shape
    num_blocks = packed["wqkv"].shape[0]
    item_num = packed["wf"].shape[1]
    bt = B if batch_tile is None else batch_tile
    assert B % bt == 0, "batch must be divisible by batch_tile"

    block_args = [packed[n] for n in _BLOCK_WEIGHT_NAMES]
    head_args = [packed[n] for n in _HEAD_WEIGHT_NAMES]

    in_specs = (
        [pl.BlockSpec((bt, S, E), lambda bi, nb: (bi, 0, 0)),     # x0
         pl.BlockSpec((bt, 1, S), lambda bi, nb: (bi, 0, 0))]     # mask bias
        + [_stacked_block_spec(a.shape) for a in block_args]
        + [_const_spec(a.shape) for a in head_args])
    out_specs = (pl.BlockSpec((bt, 1, item_num), lambda bi, nb: (bi, 0, 0)),
                 pl.BlockSpec((bt, 1, E), lambda bi, nb: (bi, 0, 0)))
    out_shape = (jax.ShapeDtypeStruct((B, 1, item_num), jnp.float32),
                 jax.ShapeDtypeStruct((B, 1, E), jnp.float32))

    # Explicit VMEM budget (double-buffered streams + resident scratch), capped
    # at 64 MiB so the same setting is valid on v5e/v6e (128 MiB) and v7x (64).
    per_block_w = sum(_nbytes(a) for a in block_args) // num_blocks
    head_w = sum(_nbytes(a) for a in head_args)
    io_blk = (bt * S * E + bt * S) * 4
    out_blk = (bt * item_num + bt * E) * 4
    scratch_b = (bt * S * E + bt * E) * 4
    est = 2 * (per_block_w + head_w + io_blk + out_blk) + scratch_b
    vmem_limit = int(min(max(2 * est, 32 << 20), 64 << 20))

    kernel = functools.partial(fused_encoder_kernel,
                               num_heads=num_heads, matmul_dtype=matmul_dtype)
    logits3, agg3 = pl.pallas_call(
        kernel,
        grid=(B // bt, num_blocks),
        in_specs=in_specs,
        out_specs=out_specs,
        out_shape=out_shape,
        scratch_shapes=[pltpu.VMEM((bt, S, E), jnp.float32),   # resident x
                        pltpu.VMEM((bt, E), jnp.float32)],     # running aggregate
        compiler_params=pltpu.CompilerParams(
            dimension_semantics=("parallel", "arbitrary"),
            vmem_limit_bytes=vmem_limit),
    )(x0, mask_bias, *block_args, *head_args)
    return logits3[:, 0, :], agg3[:, 0, :]


def sas_film_encoder_forward(token_ids, packed, *, num_heads,
                             batch_tile=None, matmul_dtype=jnp.bfloat16):
    B, S = token_ids.shape
    # Embedding gathers — plain-JAX glue (data-dependent gather).
    embeddings = jnp.take(packed["item_emb"], token_ids, axis=0)       # (B, S, E)
    x0 = embeddings + packed["pos_emb"][None, :S, :]
    # Same semantics as the PyTorch reference: mask computed AFTER the pos add.
    mask = jnp.all(x0 == 0.0, axis=2)                                  # (B, S)
    mask_bias = jnp.where(mask, NEG_MASK, 0.0).astype(jnp.float32)[:, None, :]

    logits_last, agg_out = run_fused_encoder(
        x0, mask_bias, packed, num_heads=num_heads,
        batch_tile=batch_tile, matmul_dtype=matmul_dtype)
    return logits_last, embeddings, agg_out


def pack_params(params, num_heads, weight_dtype=jnp.bfloat16):
    """One-time packing (hoisted out of the forward): transpose to (in, out)
    layout, fuse QKV into a single (E, 3E) slab, cast the matmul weight slabs
    to `weight_dtype` (bf16 halves the streamed HBM bytes and removes per-step
    casts); biases / LayerNorm params stay f32."""
    packed_blocks = []
    for bp in params["blocks"]:
        d = {
            "wqkv": bp["wqkv"].T.astype(weight_dtype),      # (E, 3E)
            "bqkv": bp["bqkv"][None, :],                    # (1, 3E)
            "wo":   bp["wo"].T.astype(weight_dtype),        # (E, E)
            "bo":   bp["bo"][None, :],
            "ln1w": bp["ln1_w"][None, :],
            "ln1b": bp["ln1_b"][None, :],
            "ln2w": bp["ln2_w"][None, :],
            "ln2b": bp["ln2_b"][None, :],
            "wff1": bp["wff1"].T.astype(weight_dtype),      # (E, 4E)
            "bff1": bp["bff1"][None, :],
            "wff2": bp["wff2"].T.astype(weight_dtype),      # (4E, E)
            "bff2": bp["bff2"][None, :],
            "wagg": bp["wagg"].T.astype(weight_dtype),      # (E, E)
            "bagg": bp["bagg"][None, :],
        }
        packed_blocks.append(d)

    packed = {k: jnp.stack([pb[k] for pb in packed_blocks], axis=0)
              for k in packed_blocks[0]}
    packed.update(
        item_emb=params["item_emb"], pos_emb=params["pos_emb"],
        wf=params["final_w"].T, bf=params["final_b"][None, :],   # head stays f32
        wa=params["agg_w"].T, ba=params["agg_b"][None, :])
    return packed


def init_params(key, item_num, embed_dim, seq_len, num_blocks):
    """Parameters in PyTorch (out, in) layout; packed once by pack_params."""
    E = embed_dim
    keys = jax.random.split(key, 4 + num_blocks)
    item_emb = jax.random.normal(keys[0], (item_num, E), jnp.float32) * 0.05
    item_emb = item_emb.at[0].set(0.0)   # padding_idx=0
    pos_emb = jax.random.normal(keys[1], (seq_len, E), jnp.float32) * 0.05
    final_w = jax.random.normal(keys[2], (item_num, E), jnp.float32) * 0.05
    final_b = jnp.zeros((item_num,), jnp.float32)
    agg_w = jax.random.normal(keys[3], (E, E), jnp.float32) * 0.05
    agg_b = jnp.zeros((E,), jnp.float32)
    blocks = []
    for i in range(num_blocks):
        bk = jax.random.split(keys[4 + i], 8)
        blocks.append(dict(
            wqkv=jax.random.normal(bk[0], (3 * E, E), jnp.float32) * 0.05,
            bqkv=jax.random.normal(bk[1], (3 * E,), jnp.float32) * 0.02,
            wo=jax.random.normal(bk[2], (E, E), jnp.float32) * 0.05,
            bo=jax.random.normal(bk[3], (E,), jnp.float32) * 0.02,
            ln1_w=jnp.ones((E,), jnp.float32),
            ln1_b=jnp.zeros((E,), jnp.float32),
            ln2_w=jnp.ones((E,), jnp.float32),
            ln2_b=jnp.zeros((E,), jnp.float32),
            wff1=jax.random.normal(bk[4], (4 * E, E), jnp.float32) * 0.05,
            bff1=jax.random.normal(bk[5], (4 * E,), jnp.float32) * 0.02,
            wff2=jax.random.normal(bk[6], (E, 4 * E), jnp.float32) * 0.05,
            bff2=jnp.zeros((E,), jnp.float32),
            wagg=jax.random.normal(bk[7], (E, E), jnp.float32) * 0.05,
            bagg=jnp.zeros((E,), jnp.float32),
        ))
    return dict(item_emb=item_emb, pos_emb=pos_emb,
                final_w=final_w, final_b=final_b,
                agg_w=agg_w, agg_b=agg_b, blocks=blocks)


if __name__ == "__main__":
    item_num, embed_dim, seq_len = 64, 32, 8
    num_blocks, num_heads = 4, 2
    batch = 2

    key = jax.random.PRNGKey(0)
    pkey, xkey = jax.random.split(key)
    params = init_params(pkey, item_num, embed_dim, seq_len, num_blocks)
    packed = pack_params(params, num_heads)     # one-time bf16 weight packing
    token_ids = jax.random.randint(xkey, (batch, seq_len), 0, item_num,
                                   dtype=jnp.int32)

    # batch_tile=None -> full batch per tile (largest MXU M-dim, weights DMA'd
    # once per block).  matmul_dtype defaults to bf16 (MXU fast path, f32 acc).
    fwd = jax.jit(functools.partial(sas_film_encoder_forward,
                                    num_heads=num_heads))
    logits_last, embeddings, agg = fwd(token_ids, packed)
    jax.block_until_ready((logits_last, embeddings, agg))

    assert logits_last.shape == (batch, item_num)
    assert embeddings.shape == (batch, seq_len, embed_dim)
    assert agg.shape == (batch, embed_dim)
    assert bool(jnp.isfinite(logits_last).all())
    assert bool(jnp.isfinite(agg).all())
    print("KERNEL_OK")
</pallas_src>

<mosaic_0001>
module attributes {stable_mosaic.version = 11 : i64} {
  func.func @fused_encoder_kernel(%arg0: i32, %arg1: i32, %arg2: memref<2x8x32xf32, #tpu.memory_space<vmem>>, %arg3: memref<2x1x8xf32, #tpu.memory_space<vmem>>, %arg4: memref<1x32x96xbf16, #tpu.memory_space<vmem>>, %arg5: memref<1x1x96xf32, #tpu.memory_space<vmem>>, %arg6: memref<1x32x32xbf16, #tpu.memory_space<vmem>>, %arg7: memref<1x1x32xf32, #tpu.memory_space<vmem>>, %arg8: memref<1x1x32xf32, #tpu.memory_space<vmem>>, %arg9: memref<1x1x32xf32, #tpu.memory_space<vmem>>, %arg10: memref<1x1x32xf32, #tpu.memory_space<vmem>>, %arg11: memref<1x1x32xf32, #tpu.memory_space<vmem>>, %arg12: memref<1x32x128xbf16, #tpu.memory_space<vmem>>, %arg13: memref<1x1x128xf32, #tpu.memory_space<vmem>>, %arg14: memref<1x128x32xbf16, #tpu.memory_space<vmem>>, %arg15: memref<1x1x32xf32, #tpu.memory_space<vmem>>, %arg16: memref<1x32x32xbf16, #tpu.memory_space<vmem>>, %arg17: memref<1x1x32xf32, #tpu.memory_space<vmem>>, %arg18: memref<32x64xf32, #tpu.memory_space<vmem>>, %arg19: memref<1x64xf32, #tpu.memory_space<vmem>>, %arg20: memref<32x32xf32, #tpu.memory_space<vmem>>, %arg21: memref<1x32xf32, #tpu.memory_space<vmem>>, %arg22: memref<2x1x64xf32, #tpu.memory_space<vmem>>, %arg23: memref<2x1x32xf32, #tpu.memory_space<vmem>>, %arg24: memref<2x8x32xf32, #tpu.memory_space<vmem>>, %arg25: memref<2x32xf32, #tpu.memory_space<vmem>>) attributes {dimension_semantics = [#tpu.dimension_semantics<parallel>, #tpu.dimension_semantics<arbitrary>], iteration_bounds = array<i64: 1, 4>, scalar_prefetch = 0 : i64, scratch_operands = 2 : i64, tpu.core_type = #tpu.core_type<tc>, window_params = [{transform_indices = @transform_0, window_bounds = array<i64: 2, 8, 32>}, {transform_indices = @transform_1, window_bounds = array<i64: 2, 1, 8>}, {transform_indices = @transform_2, window_bounds = array<i64: 1, 32, 96>}, {transform_indices = @transform_3, window_bounds = array<i64: 1, 1, 96>}, {transform_indices = @transform_4, window_bounds = array<i64: 1, 32, 32>}, {transform_indices = @transform_5, window_bounds = array<i64: 1, 1, 32>}, {transform_indices = @transform_6, window_bounds = array<i64: 1, 1, 32>}, {transform_indices = @transform_7, window_bounds = array<i64: 1, 1, 32>}, {transform_indices = @transform_8, window_bounds = array<i64: 1, 1, 32>}, {transform_indices = @transform_9, window_bounds = array<i64: 1, 1, 32>}, {transform_indices = @transform_10, window_bounds = array<i64: 1, 32, 128>}, {transform_indices = @transform_11, window_bounds = array<i64: 1, 1, 128>}, {transform_indices = @transform_12, window_bounds = array<i64: 1, 128, 32>}, {transform_indices = @transform_13, window_bounds = array<i64: 1, 1, 32>}, {transform_indices = @transform_14, window_bounds = array<i64: 1, 32, 32>}, {transform_indices = @transform_15, window_bounds = array<i64: 1, 1, 32>}, {pipeline_mode = #tpu.pipeline_mode<synchronous>, transform_indices = @transform_16, window_bounds = array<i64: 32, 64>}, {pipeline_mode = #tpu.pipeline_mode<synchronous>, transform_indices = @transform_17, window_bounds = array<i64: 1, 64>}, {pipeline_mode = #tpu.pipeline_mode<synchronous>, transform_indices = @transform_18, window_bounds = array<i64: 32, 32>}, {pipeline_mode = #tpu.pipeline_mode<synchronous>, transform_indices = @transform_19, window_bounds = array<i64: 1, 32>}, {transform_indices = @transform_20, window_bounds = array<i64: 2, 1, 64>}, {transform_indices = @transform_21, window_bounds = array<i64: 2, 1, 32>}]} {
    %c0_i32 = arith.constant 0 : i32
    %0 = arith.cmpi eq, %arg1, %c0_i32 : i32
    %1 = arith.extui %0 : i1 to i32
    %c0_i32_0 = arith.constant 0 : i32
    %2 = arith.cmpi ne, %1, %c0_i32_0 : i32
    scf.if %2 {
      %c0_83 = arith.constant 0 : index
      %c0_84 = arith.constant 0 : index
      %c0_85 = arith.constant 0 : index
      %157 = vector.load %arg2[%c0_83, %c0_84, %c0_85] : memref<2x8x32xf32, #tpu.memory_space<vmem>>, vector<2x8x32xf32>
      %c0_86 = arith.constant 0 : index
      %c0_87 = arith.constant 0 : index
      %c0_88 = arith.constant 0 : index
      %158 = vector.load %arg24[%c0_86, %c0_87, %c0_88] : memref<2x8x32xf32, #tpu.memory_space<vmem>>, vector<2x8x32xf32>
      tpu.vector_store %arg24[%c0_86, %c0_87, %c0_88], %157 {strides = array<i32>} : memref<2x8x32xf32, #tpu.memory_space<vmem>>, vector<2x8x32xf32>,
      %cst_89 = arith.constant 0.000000e+00 : f32
      %159 = vector.broadcast %cst_89 : f32 to vector<2x32xf32>
      %c0_90 = arith.constant 0 : index
      %c0_91 = arith.constant 0 : index
      %160 = vector.load %arg25[%c0_90, %c0_91] : memref<2x32xf32, #tpu.memory_space<vmem>>, vector<2x32xf32>
      tpu.vector_store %arg25[%c0_90, %c0_91], %159 {strides = array<i32>} : memref<2x32xf32, #tpu.memory_space<vmem>>, vector<2x32xf32>,
    } else {
    }
    %c0 = arith.constant 0 : index
    %c0_1 = arith.constant 0 : index
    %c0_2 = arith.constant 0 : index
    %3 = vector.load %arg24[%c0, %c0_1, %c0_2] : memref<2x8x32xf32, #tpu.memory_space<vmem>>, vector<2x8x32xf32>
    %4 = vector.shape_cast %3 : vector<2x8x32xf32> to vector<16x32xf32>
    %5 = arith.truncf %4 : vector<16x32xf32> to vector<16x32xbf16>
    %c0_3 = arith.constant 0 : index
    %c0_4 = arith.constant 0 : index
    %c0_5 = arith.constant 0 : index
    %6 = vector.load %arg3[%c0_3, %c0_4, %c0_5] : memref<2x1x8xf32, #tpu.memory_space<vmem>>, vector<2x1x8xf32>
    %c0_6 = arith.constant 0 : index
    %c0_7 = arith.constant 0 : index
    %c0_8 = arith.constant 0 : index
    %7 = vector.load %arg4[%c0_6, %c0_7, %c0_8] : memref<1x32x96xbf16, #tpu.memory_space<vmem>>, vector<1x32x96xbf16>
    %8 = vector.shape_cast %7 : vector<1x32x96xbf16> to vector<32x96xbf16>
    %cst = arith.constant dense<0.000000e+00> : vector<16x96xf32>
    %9 = tpu.matmul %5, %8, %cst {dimension_numbers = #tpu.dot_dimension_numbers<[1], [0], [0], [1], [0, 0, 1, 1], [], []>} : vector<16x32xbf16>, vector<32x96xbf16>, vector<16x96xf32> -> vector<16x96xf32>
    %c0_9 = arith.constant 0 : index
    %c0_10 = arith.constant 0 : index
    %c0_11 = arith.constant 0 : index
    %10 = vector.load %arg5[%c0_9, %c0_10, %c0_11] : memref<1x1x96xf32, #tpu.memory_space<vmem>>, vector<1x1x96xf32>
    %11 = vector.shape_cast %10 : vector<1x1x96xf32> to vector<1x96xf32>
    %12 = vector.broadcast %11 : vector<1x96xf32> to vector<16x96xf32>
    %13 = arith.addf %9, %12 : vector<16x96xf32>
    %14 = arith.truncf %13 : vector<16x96xf32> to vector<16x96xbf16>
    %15 = vector.shape_cast %14 : vector<16x96xbf16> to vector<2x8x96xbf16>
    %16 = vector.extract_strided_slice %15 {offsets = [0, 0, 0], sizes = [2, 8, 16], strides = [1, 1, 1]} : vector<2x8x96xbf16> to vector<2x8x16xbf16>
    %17 = vector.extract_strided_slice %15 {offsets = [0, 0, 32], sizes = [2, 8, 16], strides = [1, 1, 1]} : vector<2x8x96xbf16> to vector<2x8x16xbf16>
    %18 = vector.extract_strided_slice %15 {offsets = [0, 0, 64], sizes = [2, 8, 16], strides = [1, 1, 1]} : vector<2x8x96xbf16> to vector<2x8x16xbf16>
    "tpu.trace_start"() <{level = 10 : i32, message = "bqd,bkd->bqk"}> : () -> ()
    %cst_12 = arith.constant dense<0.000000e+00> : vector<2x8x8xf32>
    %19 = tpu.matmul %16, %17, %cst_12 {dimension_numbers = #tpu.dot_dimension_numbers<[2], [2], [1], [1], [0, 0, 0, 1, 1, 1], [0], [0]>} : vector<2x8x16xbf16>, vector<2x8x16xbf16>, vector<2x8x8xf32> -> vector<2x8x8xf32>
    "tpu.trace_stop"() : () -> ()
    %cst_13 = arith.constant 2.500000e-01 : f32
    %20 = vector.broadcast %cst_13 : f32 to vector<2x8x8xf32>
    %21 = arith.mulf %19, %20 : vector<2x8x8xf32>
    %22 = vector.broadcast %6 : vector<2x1x8xf32> to vector<2x8x8xf32>
    %23 = arith.addf %21, %22 : vector<2x8x8xf32>
    %cst_14 = arith.constant dense<0xFF800000> : vector<2x8xf32>
    %24 = vector.multi_reduction <maximumf>, %23, %cst_14 [2] : vector<2x8x8xf32> to vector<2x8xf32>
    %25 = vector.shape_cast %24 : vector<2x8xf32> to vector<2x8x1xf32>
    %26 = vector.broadcast %25 : vector<2x8x1xf32> to vector<2x8x8xf32>
    %27 = arith.subf %23, %26 : vector<2x8x8xf32>
    %28 = math.exp %27 : vector<2x8x8xf32>
    %cst_15 = arith.constant dense<0.000000e+00> : vector<2x8xf32>
    %29 = vector.multi_reduction <add>, %28, %cst_15 [2] : vector<2x8x8xf32> to vector<2x8xf32>
    %30 = vector.shape_cast %29 : vector<2x8xf32> to vector<2x8x1xf32>
    %31 = tpu.reciprocal %30 {approx = true} : vector<2x8x1xf32> -> vector<2x8x1xf32>
    %32 = vector.broadcast %31 : vector<2x8x1xf32> to vector<2x8x8xf32>
    %33 = arith.mulf %28, %32 : vector<2x8x8xf32>
    %34 = arith.truncf %33 : vector<2x8x8xf32> to vector<2x8x8xbf16>
    "tpu.trace_start"() <{level = 10 : i32, message = "bqk,bkd->bqd"}> : () -> ()
    %cst_16 = arith.constant dense<0.000000e+00> : vector<2x8x16xf32>
    %35 = tpu.matmul %34, %18, %cst_16 {dimension_numbers = #tpu.dot_dimension_numbers<[2], [1], [1], [2], [0, 0, 0, 1, 1, 2], [0], [0]>} : vector<2x8x8xbf16>, vector<2x8x16xbf16>, vector<2x8x16xf32> -> vector<2x8x16xf32>
    "tpu.trace_stop"() : () -> ()
    %36 = vector.extract_strided_slice %15 {offsets = [0, 0, 16], sizes = [2, 8, 16], strides = [1, 1, 1]} : vector<2x8x96xbf16> to vector<2x8x16xbf16>
    %37 = vector.extract_strided_slice %15 {offsets = [0, 0, 48], sizes = [2, 8, 16], strides = [1, 1, 1]} : vector<2x8x96xbf16> to vector<2x8x16xbf16>
    %38 = vector.extract_strided_slice %15 {offsets = [0, 0, 80], sizes = [2, 8, 16], strides = [1, 1, 1]} : vector<2x8x96xbf16> to vector<2x8x16xbf16>
    "tpu.trace_start"() <{level = 10 : i32, message = "bqd,bkd->bqk"}> : () -> ()
    %cst_17 = arith.constant dense<0.000000e+00> : vector<2x8x8xf32>
    %39 = tpu.matmul %36, %37, %cst_17 {dimension_numbers = #tpu.dot_dimension_numbers<[2], [2], [1], [1], [0, 0, 0, 1, 1, 1], [0], [0]>} : vector<2x8x16xbf16>, vector<2x8x16xbf16>, vector<2x8x8xf32> -> vector<2x8x8xf32>
    "tpu.trace_stop"() : () -> ()
    %cst_18 = arith.constant 2.500000e-01 : f32
    %40 = vector.broadcast %cst_18 : f32 to vector<2x8x8xf32>
    %41 = arith.mulf %39, %40 : vector<2x8x8xf32>
    %42 = vector.broadcast %6 : vector<2x1x8xf32> to vector<2x8x8xf32>
    %43 = arith.addf %41, %42 : vector<2x8x8xf32>
    %cst_19 = arith.constant dense<0xFF800000> : vector<2x8xf32>
    %44 = vector.multi_reduction <maximumf>, %43, %cst_19 [2] : vector<2x8x8xf32> to vector<2x8xf32>
    %45 = vector.shape_cast %44 : vector<2x8xf32> to vector<2x8x1xf32>
    %46 = vector.broadcast %45 : vector<2x8x1xf32> to vector<2x8x8xf32>
    %47 = arith.subf %43, %46 : vector<2x8x8xf32>
    %48 = math.exp %47 : vector<2x8x8xf32>
    %cst_20 = arith.constant dense<0.000000e+00> : vector<2x8xf32>
    %49 = vector.multi_reduction <add>, %48, %cst_20 [2] : vector<2x8x8xf32> to vector<2x8xf32>
    %50 = vector.shape_cast %49 : vector<2x8xf32> to vector<2x8x1xf32>
    %51 = tpu.reciprocal %50 {approx = true} : vector<2x8x1xf32> -> vector<2x8x1xf32>
    %52 = vector.broadcast %51 : vector<2x8x1xf32> to vector<2x8x8xf32>
    %53 = arith.mulf %48, %52 : vector<2x8x8xf32>
    %54 = arith.truncf %53 : vector<2x8x8xf32> to vector<2x8x8xbf16>
    "tpu.trace_start"() <{level = 10 : i32, message = "bqk,bkd->bqd"}> : () -> ()
    %cst_21 = arith.constant dense<0.000000e+00> : vector<2x8x16xf32>
    %55 = tpu.matmul %54, %38, %cst_21 {dimension_numbers = #tpu.dot_dimension_numbers<[2], [1], [1], [2], [0, 0, 0, 1, 1, 2], [0], [0]>} : vector<2x8x8xbf16>, vector<2x8x16xbf16>, vector<2x8x16xf32> -> vector<2x8x16xf32>
    "tpu.trace_stop"() : () -> ()
    %56 = tpu.concatenate %35, %55 in 2 : vector<2x8x16xf32>, vector<2x8x16xf32> -> vector<2x8x32xf32>
    %57 = vector.shape_cast %56 : vector<2x8x32xf32> to vector<16x32xf32>
    %58 = arith.truncf %57 : vector<16x32xf32> to vector<16x32xbf16>
    %c0_22 = arith.constant 0 : index
    %c0_23 = arith.constant 0 : index
    %c0_24 = arith.constant 0 : index
    %59 = vector.load %arg6[%c0_22, %c0_23, %c0_24] : memref<1x32x32xbf16, #tpu.memory_space<vmem>>, vector<1x32x32xbf16>
    %60 = vector.shape_cast %59 : vector<1x32x32xbf16> to vector<32x32xbf16>
    %cst_25 = arith.constant dense<0.000000e+00> : vector<16x32xf32>
    %61 = tpu.matmul %58, %60, %cst_25 {dimension_numbers = #tpu.dot_dimension_numbers<[1], [0], [0], [1], [0, 0, 1, 1], [], []>} : vector<16x32xbf16>, vector<32x32xbf16>, vector<16x32xf32> -> vector<16x32xf32>
    %c0_26 = arith.constant 0 : index
    %c0_27 = arith.constant 0 : index
    %c0_28 = arith.constant 0 : index
    %62 = vector.load %arg7[%c0_26, %c0_27, %c0_28] : memref<1x1x32xf32, #tpu.memory_space<vmem>>, vector<1x1x32xf32>
    %63 = vector.shape_cast %62 : vector<1x1x32xf32> to vector<1x32xf32>
    %64 = vector.broadcast %63 : vector<1x32xf32> to vector<16x32xf32>
    %65 = arith.addf %61, %64 : vector<16x32xf32>
    %66 = arith.addf %4, %65 : vector<16x32xf32>
    %c0_29 = arith.constant 0 : index
    %c0_30 = arith.constant 0 : index
    %c0_31 = arith.constant 0 : index
    %67 = vector.load %arg8[%c0_29, %c0_30, %c0_31] : memref<1x1x32xf32, #tpu.memory_space<vmem>>, vector<1x1x32xf32>
    %68 = vector.shape_cast %67 : vector<1x1x32xf32> to vector<1x32xf32>
    %c0_32 = arith.constant 0 : index
    %c0_33 = arith.constant 0 : index
    %c0_34 = arith.constant 0 : index
    %69 = vector.load %arg9[%c0_32, %c0_33, %c0_34] : memref<1x1x32xf32, #tpu.memory_space<vmem>>, vector<1x1x32xf32>
    %70 = vector.shape_cast %69 : vector<1x1x32xf32> to vector<1x32xf32>
    %cst_35 = arith.constant dense<0.000000e+00> : vector<16xf32>
    %71 = vector.multi_reduction <add>, %66, %cst_35 [1] : vector<16x32xf32> to vector<16xf32>
    %72 = vector.shape_cast %71 : vector<16xf32> to vector<16x1xf32>
    %cst_36 = arith.constant 3.200000e+01 : f32
    %73 = vector.broadcast %cst_36 : f32 to vector<16x1xf32>
    %74 = arith.divf %72, %73 : vector<16x1xf32>
    %75 = vector.broadcast %74 : vector<16x1xf32> to vector<16x32xf32>
    %76 = arith.subf %66, %75 : vector<16x32xf32>
    %77 = arith.mulf %76, %76 : vector<16x32xf32>
    %cst_37 = arith.constant dense<0.000000e+00> : vector<16xf32>
    %78 = vector.multi_reduction <add>, %77, %cst_37 [1] : vector<16x32xf32> to vector<16xf32>
    %79 = vector.shape_cast %78 : vector<16xf32> to vector<16x1xf32>
    %cst_38 = arith.constant 3.200000e+01 : f32
    %80 = vector.broadcast %cst_38 : f32 to vector<16x1xf32>
    %81 = arith.divf %79, %80 : vector<16x1xf32>
    %82 = vector.broadcast %74 : vector<16x1xf32> to vector<16x32xf32>
    %83 = arith.subf %66, %82 : vector<16x32xf32>
    %cst_39 = arith.constant 9.99999974E-6 : f32
    %84 = vector.broadcast %cst_39 : f32 to vector<16x1xf32>
    %85 = arith.addf %81, %84 : vector<16x1xf32>
    %86 = math.rsqrt %85 : vector<16x1xf32>
    %87 = vector.broadcast %86 : vector<16x1xf32> to vector<16x32xf32>
    %88 = arith.mulf %83, %87 : vector<16x32xf32>
    %89 = vector.broadcast %68 : vector<1x32xf32> to vector<16x32xf32>
    %90 = arith.mulf %88, %89 : vector<16x32xf32>
    %91 = vector.broadcast %70 : vector<1x32xf32> to vector<16x32xf32>
    %92 = arith.addf %90, %91 : vector<16x32xf32>
    %93 = arith.truncf %92 : vector<16x32xf32> to vector<16x32xbf16>
    %c0_40 = arith.constant 0 : index
    %c0_41 = arith.constant 0 : index
    %c0_42 = arith.constant 0 : index
    %94 = vector.load %arg12[%c0_40, %c0_41, %c0_42] : memref<1x32x128xbf16, #tpu.memory_space<vmem>>, vector<1x32x128xbf16>
    %95 = vector.shape_cast %94 : vector<1x32x128xbf16> to vector<32x128xbf16>
    %cst_43 = arith.constant dense<0.000000e+00> : vector<16x128xf32>
    %96 = tpu.matmul %93, %95, %cst_43 {dimension_numbers = #tpu.dot_dimension_numbers<[1], [0], [0], [1], [0, 0, 1, 1], [], []>} : vector<16x32xbf16>, vector<32x128xbf16>, vector<16x128xf32> -> vector<16x128xf32>
    %c0_44 = arith.constant 0 : index
    %c0_45 = arith.constant 0 : index
    %c0_46 = arith.constant 0 : index
    %97 = vector.load %arg13[%c0_44, %c0_45, %c0_46] : memref<1x1x128xf32, #tpu.memory_space<vmem>>, vector<1x1x128xf32>
    %98 = vector.shape_cast %97 : vector<1x1x128xf32> to vector<1x128xf32>
    %99 = vector.broadcast %98 : vector<1x128xf32> to vector<16x128xf32>
    %100 = arith.addf %96, %99 : vector<16x128xf32>
    %cst_47 = arith.constant 0.000000e+00 : f32
    %101 = vector.broadcast %cst_47 : f32 to vector<16x128xf32>
    %102 = arith.maximumf %100, %101 : vector<16x128xf32>
    %103 = arith.truncf %102 : vector<16x128xf32> to vector<16x128xbf16>
    %c0_48 = arith.constant 0 : index
    %c0_49 = arith.constant 0 : index
    %c0_50 = arith.constant 0 : index
    %104 = vector.load %arg14[%c0_48, %c0_49, %c0_50] : memref<1x128x32xbf16, #tpu.memory_space<vmem>>, vector<1x128x32xbf16>
    %105 = vector.shape_cast %104 : vector<1x128x32xbf16> to vector<128x32xbf16>
    %cst_51 = arith.constant dense<0.000000e+00> : vector<16x32xf32>
    %106 = tpu.matmul %103, %105, %cst_51 {dimension_numbers = #tpu.dot_dimension_numbers<[1], [0], [0], [1], [0, 0, 1, 1], [], []>} : vector<16x128xbf16>, vector<128x32xbf16>, vector<16x32xf32> -> vector<16x32xf32>
    %c0_52 = arith.constant 0 : index
    %c0_53 = arith.constant 0 : index
    %c0_54 = arith.constant 0 : index
    %107 = vector.load %arg15[%c0_52, %c0_53, %c0_54] : memref<1x1x32xf32, #tpu.memory_space<vmem>>, vector<1x1x32xf32>
    %108 = vector.shape_cast %107 : vector<1x1x32xf32> to vector<1x32xf32>
    %109 = vector.broadcast %108 : vector<1x32xf32> to vector<16x32xf32>
    %110 = arith.addf %106, %109 : vector<16x32xf32>
    %111 = arith.addf %92, %110 : vector<16x32xf32>
    %c0_55 = arith.constant 0 : index
    %c0_56 = arith.constant 0 : index
    %c0_57 = arith.constant 0 : index
    %112 = vector.load %arg10[%c0_55, %c0_56, %c0_57] : memref<1x1x32xf32, #tpu.memory_space<vmem>>, vector<1x1x32xf32>
    %113 = vector.shape_cast %112 : vector<1x1x32xf32> to vector<1x32xf32>
    %c0_58 = arith.constant 0 : index
    %c0_59 = arith.constant 0 : index
    %c0_60 = arith.constant 0 : index
    %114 = vector.load %arg11[%c0_58, %c0_59, %c0_60] : memref<1x1x32xf32, #tpu.memory_space<vmem>>, vector<1x1x32xf32>
    %115 = vector.shape_cast %114 : vector<1x1x32xf32> to vector<1x32xf32>
    %cst_61 = arith.constant dense<0.000000e+00> : vector<16xf32>
    %116 = vector.multi_reduction <add>, %111, %cst_61 [1] : vector<16x32xf32> to vector<16xf32>
    %117 = vector.shape_cast %116 : vector<16xf32> to vector<16x1xf32>
    %cst_62 = arith.constant 3.200000e+01 : f32
    %118 = vector.broadcast %cst_62 : f32 to vector<16x1xf32>
    %119 = arith.divf %117, %118 : vector<16x1xf32>
    %120 = vector.broadcast %119 : vector<16x1xf32> to vector<16x32xf32>
    %121 = arith.subf %111, %120 : vector<16x32xf32>
    %122 = arith.mulf %121, %121 : vector<16x32xf32>
    %cst_63 = arith.constant dense<0.000000e+00> : vector<16xf32>
    %123 = vector.multi_reduction <add>, %122, %cst_63 [1] : vector<16x32xf32> to vector<16xf32>
    %124 = vector.shape_cast %123 : vector<16xf32> to vector<16x1xf32>
    %cst_64 = arith.constant 3.200000e+01 : f32
    %125 = vector.broadcast %cst_64 : f32 to vector<16x1xf32>
    %126 = arith.divf %124, %125 : vector<16x1xf32>
    %127 = vector.broadcast %119 : vector<16x1xf32> to vector<16x32xf32>
    %128 = arith.subf %111, %127 : vector<16x32xf32>
    %cst_65 = arith.constant 9.99999974E-6 : f32
    %129 = vector.broadcast %cst_65 : f32 to vector<16x1xf32>
    %130 = arith.addf %126, %129 : vector<16x1xf32>
    %131 = math.rsqrt %130 : vector<16x1xf32>
    %132 = vector.broadcast %131 : vector<16x1xf32> to vector<16x32xf32>
    %133 = arith.mulf %128, %132 : vector<16x32xf32>
    %134 = vector.broadcast %113 : vector<1x32xf32> to vector<16x32xf32>
    %135 = arith.mulf %133, %134 : vector<16x32xf32>
    %136 = vector.broadcast %115 : vector<1x32xf32> to vector<16x32xf32>
    %137 = arith.addf %135, %136 : vector<16x32xf32>
    %138 = vector.shape_cast %137 : vector<16x32xf32> to vector<2x8x32xf32>
    %c0_66 = arith.constant 0 : index
    %c0_67 = arith.constant 0 : index
    %c0_68 = arith.constant 0 : index
    %139 = vector.load %arg24[%c0_66, %c0_67, %c0_68] : memref<2x8x32xf32, #tpu.memory_space<vmem>>, vector<2x8x32xf32>
    tpu.vector_store %arg24[%c0_66, %c0_67, %c0_68], %138 {strides = array<i32>} : memref<2x8x32xf32, #tpu.memory_space<vmem>>, vector<2x8x32xf32>,
    %cst_69 = arith.constant dense<0.000000e+00> : vector<2x32xf32>
    %140 = vector.multi_reduction <add>, %138, %cst_69 [1] : vector<2x8x32xf32> to vector<2x32xf32>
    %cst_70 = arith.constant 1.250000e-01 : f32
    %141 = vector.broadcast %cst_70 : f32 to vector<2x32xf32>
    %142 = arith.mulf %140, %141 : vector<2x32xf32>
    %c0_71 = arith.constant 0 : index
    %c0_72 = arith.constant 0 : index
    %143 = vector.load %arg25[%c0_71, %c0_72] : memref<2x32xf32, #tpu.memory_space<vmem>>, vector<2x32xf32>
    %144 = arith.truncf %142 : vector<2x32xf32> to vector<2x32xbf16>
    %c0_73 = arith.constant 0 : index
    %c0_74 = arith.constant 0 : index
    %c0_75 = arith.constant 0 : index
    %145 = vector.load %arg16[%c0_73, %c0_74, %c0_75] : memref<1x32x32xbf16, #tpu.memory_space<vmem>>, vector<1x32x32xbf16>
    %146 = vector.shape_cast %145 : vector<1x32x32xbf16> to vector<32x32xbf16>
    %cst_76 = arith.constant dense<0.000000e+00> : vector<2x32xf32>
    %147 = tpu.matmul %144, %146, %cst_76 {dimension_numbers = #tpu.dot_dimension_numbers<[1], [0], [0], [1], [0, 0, 1, 1], [], []>} : vector<2x32xbf16>, vector<32x32xbf16>, vector<2x32xf32> -> vector<2x32xf32>
    %148 = arith.addf %143, %147 : vector<2x32xf32>
    %c0_77 = arith.constant 0 : index
    %c0_78 = arith.constant 0 : index
    %c0_79 = arith.constant 0 : index
    %149 = vector.load %arg17[%c0_77, %c0_78, %c0_79] : memref<1x1x32xf32, #tpu.memory_space<vmem>>, vector<1x1x32xf32>
    %150 = vector.shape_cast %149 : vector<1x1x32xf32> to vector<1x32xf32>
    %151 = vector.broadcast %150 : vector<1x32xf32> to vector<2x32xf32>
    %152 = arith.addf %148, %151 : vector<2x32xf32>
    %c0_80 = arith.constant 0 : index
    %c0_81 = arith.constant 0 : index
    %153 = vector.load %arg25[%c0_80, %c0_81] : memref<2x32xf32, #tpu.memory_space<vmem>>, vector<2x32xf32>
    tpu.vector_store %arg25[%c0_80, %c0_81], %152 {strides = array<i32>} : memref<2x32xf32, #tpu.memory_space<vmem>>, vector<2x32xf32>,
    %c3_i32 = arith.constant 3 : i32
    %154 = arith.cmpi eq, %arg1, %c3_i32 : i32
    %155 = arith.extui %154 : i1 to i32
    %c0_i32_82 = arith.constant 0 : i32
    %156 = arith.cmpi ne, %155, %c0_i32_82 : i32
    scf.if %156 {
      %157 = vector.extract_strided_slice %138 {offsets = [0, 7, 0], sizes = [2, 1, 32], strides = [1, 1, 1]} : vector<2x8x32xf32> to vector<2x1x32xf32>
      %158 = vector.shape_cast %157 : vector<2x1x32xf32> to vector<2x32xf32>
      %c0_83 = arith.constant 0 : index
      %c0_84 = arith.constant 0 : index
      %159 = vector.load %arg18[%c0_83, %c0_84] : memref<32x64xf32, #tpu.memory_space<vmem>>, vector<32x64xf32>
      %cst_85 = arith.constant dense<0.000000e+00> : vector<2x64xf32>
      %160 = tpu.matmul %158, %159, %cst_85 {dimension_numbers = #tpu.dot_dimension_numbers<[1], [0], [0], [1], [0, 0, 1, 1], [], []>} : vector<2x32xf32>, vector<32x64xf32>, vector<2x64xf32> -> vector<2x64xf32>
      %c0_86 = arith.constant 0 : index
      %c0_87 = arith.constant 0 : index
      %161 = vector.load %arg19[%c0_86, %c0_87] : memref<1x64xf32, #tpu.memory_space<vmem>>, vector<1x64xf32>
      %162 = vector.broadcast %161 : vector<1x64xf32> to vector<2x64xf32>
      %163 = arith.addf %160, %162 : vector<2x64xf32>
      %164 = vector.shape_cast %163 : vector<2x64xf32> to vector<2x1x64xf32>
      %c0_88 = arith.constant 0 : index
      %c0_89 = arith.constant 0 : index
      %c0_90 = arith.constant 0 : index
      %165 = vector.load %arg22[%c0_88, %c0_89, %c0_90] : memref<2x1x64xf32, #tpu.memory_space<vmem>>, vector<2x1x64xf32>
      tpu.vector_store %arg22[%c0_88, %c0_89, %c0_90], %164 {strides = array<i32>} : memref<2x1x64xf32, #tpu.memory_space<vmem>>, vector<2x1x64xf32>,
      %c0_91 = arith.constant 0 : index
      %c0_92 = arith.constant 0 : index
      %166 = vector.load %arg25[%c0_91, %c0_92] : memref<2x32xf32, #tpu.memory_space<vmem>>, vector<2x32xf32>
      %c0_93 = arith.constant 0 : index
      %c0_94 = arith.constant 0 : index
      %167 = vector.load %arg20[%c0_93, %c0_94] : memref<32x32xf32, #tpu.memory_space<vmem>>, vector<32x32xf32>
      %cst_95 = arith.constant dense<0.000000e+00> : vector<2x32xf32>
      %168 = tpu.matmul %166, %167, %cst_95 {dimension_numbers = #tpu.dot_dimension_numbers<[1], [0], [0], [1], [0, 0, 1, 1], [], []>} : vector<2x32xf32>, vector<32x32xf32>, vector<2x32xf32> -> vector<2x32xf32>
      %c0_96 = arith.constant 0 : index
      %c0_97 = arith.constant 0 : index
      %169 = vector.load %arg21[%c0_96, %c0_97] : memref<1x32xf32, #tpu.memory_space<vmem>>, vector<1x32xf32>
      %170 = vector.broadcast %169 : vector<1x32xf32> to vector<2x32xf32>
      %171 = arith.addf %168, %170 : vector<2x32xf32>
      %172 = vector.shape_cast %171 : vector<2x32xf32> to vector<2x1x32xf32>
      %c0_98 = arith.constant 0 : index
      %c0_99 = arith.constant 0 : index
      %c0_100 = arith.constant 0 : index
      %173 = vector.load %arg23[%c0_98, %c0_99, %c0_100] : memref<2x1x32xf32, #tpu.memory_space<vmem>>, vector<2x1x32xf32>
      tpu.vector_store %arg23[%c0_98, %c0_99, %c0_100], %172 {strides = array<i32>} : memref<2x1x32xf32, #tpu.memory_space<vmem>>, vector<2x1x32xf32>,
    } else {
    }
    return
  }
  func.func @transform_0(%arg0: i32, %arg1: i32) -> (i32, i32, i32) {
    %c0_i32 = arith.constant 0 : i32
    %c0_i32_0 = arith.constant 0 : i32
    %c0_i32_1 = arith.constant 0 : i32
    return %arg0, %c0_i32, %c0_i32_0 : i32, i32, i32
  }
  func.func @transform_1(%arg0: i32, %arg1: i32) -> (i32, i32, i32) {
    %c0_i32 = arith.constant 0 : i32
    %c0_i32_0 = arith.constant 0 : i32
    %c0_i32_1 = arith.constant 0 : i32
    return %arg0, %c0_i32, %c0_i32_0 : i32, i32, i32
  }
  func.func @transform_2(%arg0: i32, %arg1: i32) -> (i32, i32, i32) {
    %c0_i32 = arith.constant 0 : i32
    %c0_i32_0 = arith.constant 0 : i32
    %c0_i32_1 = arith.constant 0 : i32
    return %arg1, %c0_i32, %c0_i32_0 : i32, i32, i32
  }
  func.func @transform_3(%arg0: i32, %arg1: i32) -> (i32, i32, i32) {
    %c0_i32 = arith.constant 0 : i32
    %c0_i32_0 = arith.constant 0 : i32
    %c0_i32_1 = arith.constant 0 : i32
    return %arg1, %c0_i32, %c0_i32_0 : i32, i32, i32
  }
  func.func @transform_4(%arg0: i32, %arg1: i32) -> (i32, i32, i32) {
    %c0_i32 = arith.constant 0 : i32
    %c0_i32_0 = arith.constant 0 : i32
    %c0_i32_1 = arith.constant 0 : i32
    return %arg1, %c0_i32, %c0_i32_0 : i32, i32, i32
  }
  func.func @transform_5(%arg0: i32, %arg1: i32) -> (i32, i32, i32) {
    %c0_i32 = arith.constant 0 : i32
    %c0_i32_0 = arith.constant 0 : i32
    %c0_i32_1 = arith.constant 0 : i32
    return %arg1, %c0_i32, %c0_i32_0 : i32, i32, i32
  }
  func.func @transform_6(%arg0: i32, %arg1: i32) -> (i32, i32, i32) {
    %c0_i32 = arith.constant 0 : i32
    %c0_i32_0 = arith.constant 0 : i32
    %c0_i32_1 = arith.constant 0 : i32
    return %arg1, %c0_i32, %c0_i32_0 : i32, i32, i32
  }
  func.func @transform_7(%arg0: i32, %arg1: i32) -> (i32, i32, i32) {
    %c0_i32 = arith.constant 0 : i32
    %c0_i32_0 = arith.constant 0 : i32
    %c0_i32_1 = arith.constant 0 : i32
    return %arg1, %c0_i32, %c0_i32_0 : i32, i32, i32
  }
  func.func @transform_8(%arg0: i32, %arg1: i32) -> (i32, i32, i32) {
    %c0_i32 = arith.constant 0 : i32
    %c0_i32_0 = arith.constant 0 : i32
    %c0_i32_1 = arith.constant 0 : i32
    return %arg1, %c0_i32, %c0_i32_0 : i32, i32, i32
  }
  func.func @transform_9(%arg0: i32, %arg1: i32) -> (i32, i32, i32) {
    %c0_i32 = arith.constant 0 : i32
    %c0_i32_0 = arith.constant 0 : i32
    %c0_i32_1 = arith.constant 0 : i32
    return %arg1, %c0_i32, %c0_i32_0 : i32, i32, i32
  }
  func.func @transform_10(%arg0: i32, %arg1: i32) -> (i32, i32, i32) {
    %c0_i32 = arith.constant 0 : i32
    %c0_i32_0 = arith.constant 0 : i32
    %c0_i32_1 = arith.constant 0 : i32
    return %arg1, %c0_i32, %c0_i32_0 : i32, i32, i32
  }
  func.func @transform_11(%arg0: i32, %arg1: i32) -> (i32, i32, i32) {
    %c0_i32 = arith.constant 0 : i32
    %c0_i32_0 = arith.constant 0 : i32
    %c0_i32_1 = arith.constant 0 : i32
    return %arg1, %c0_i32, %c0_i32_0 : i32, i32, i32
  }
  func.func @transform_12(%arg0: i32, %arg1: i32) -> (i32, i32, i32) {
    %c0_i32 = arith.constant 0 : i32
    %c0_i32_0 = arith.constant 0 : i32
    %c0_i32_1 = arith.constant 0 : i32
    return %arg1, %c0_i32, %c0_i32_0 : i32, i32, i32
  }
  func.func @transform_13(%arg0: i32, %arg1: i32) -> (i32, i32, i32) {
    %c0_i32 = arith.constant 0 : i32
    %c0_i32_0 = arith.constant 0 : i32
    %c0_i32_1 = arith.constant 0 : i32
    return %arg1, %c0_i32, %c0_i32_0 : i32, i32, i32
  }
  func.func @transform_14(%arg0: i32, %arg1: i32) -> (i32, i32, i32) {
    %c0_i32 = arith.constant 0 : i32
    %c0_i32_0 = arith.constant 0 : i32
    %c0_i32_1 = arith.constant 0 : i32
    return %arg1, %c0_i32, %c0_i32_0 : i32, i32, i32
  }
  func.func @transform_15(%arg0: i32, %arg1: i32) -> (i32, i32, i32) {
    %c0_i32 = arith.constant 0 : i32
    %c0_i32_0 = arith.constant 0 : i32
    %c0_i32_1 = arith.constant 0 : i32
    return %arg1, %c0_i32, %c0_i32_0 : i32, i32, i32
  }
  func.func @transform_16(%arg0: i32, %arg1: i32) -> (i32, i32) {
    %c0_i32 = arith.constant 0 : i32
    %c0_i32_0 = arith.constant 0 : i32
    %c0_i32_1 = arith.constant 0 : i32
    return %c0_i32, %c0_i32_0 : i32, i32
  }
  func.func @transform_17(%arg0: i32, %arg1: i32) -> (i32, i32) {
    %c0_i32 = arith.constant 0 : i32
    %c0_i32_0 = arith.constant 0 : i32
    %c0_i32_1 = arith.constant 0 : i32
    return %c0_i32, %c0_i32_0 : i32, i32
  }
  func.func @transform_18(%arg0: i32, %arg1: i32) -> (i32, i32) {
    %c0_i32 = arith.constant 0 : i32
    %c0_i32_0 = arith.constant 0 : i32
    %c0_i32_1 = arith.constant 0 : i32
    return %c0_i32, %c0_i32_0 : i32, i32
  }
  func.func @transform_19(%arg0: i32, %arg1: i32) -> (i32, i32) {
    %c0_i32 = arith.constant 0 : i32
    %c0_i32_0 = arith.constant 0 : i32
    %c0_i32_1 = arith.constant 0 : i32
    return %c0_i32, %c0_i32_0 : i32, i32
  }
  func.func @transform_20(%arg0: i32, %arg1: i32) -> (i32, i32, i32) {
    %c0_i32 = arith.constant 0 : i32
    %c0_i32_0 = arith.constant 0 : i32
    %c0_i32_1 = arith.constant 0 : i32
    return %arg0, %c0_i32, %c0_i32_0 : i32, i32, i32
  }
  func.func @transform_21(%arg0: i32, %arg1: i32) -> (i32, i32, i32) {
    %c0_i32 = arith.constant 0 : i32
    %c0_i32_0 = arith.constant 0 : i32
    %c0_i32_1 = arith.constant 0 : i32
    return %arg0, %c0_i32, %c0_i32_0 : i32, i32, i32
  }
}

</mosaic_0001>

<bundles_post_ra>
// kernel: sas_film_encoder_forward.1
= control target key start
LH: loop header
LB: loop body
LE: loop exit
PB: predicated region body
PF: predicated region fallthrough
CT: control target
= control target key end

     0   :  { %s3356_s0 = inlined_call_operand.vmem [shape: f32[2,8,32], index: 0, kind: input, shape index: {}]   ;;  %s3357_s1 = inlined_call_operand.vmem [shape: f32[2,1,8], index: 1, kind: input, shape index: {}]   ;;  %s3358_s2 = inlined_call_operand.vmem [shape: bf16[4,32,96], index: 2, kind: input, shape index: {}]   ;;  %s3359_s3 = inlined_call_operand.vmem [shape: f32[4,1,96], index: 3, kind: input, shape index: {}]   ;;  %s3360_s4 = inlined_call_operand.vmem [shape: bf16[4,32,32], index: 4, kind: input, shape index: {}]   ;;  %s3361_s5 = inlined_call_operand.vmem [shape: f32[4,1,32], index: 5, kind: input, shape index: {}]   ;;  %s3362_s6 = inlined_call_operand.vmem [shape: f32[4,1,32], index: 6, kind: input, shape index: {}]   ;;  %s3363_s7 = inlined_call_operand.vmem [shape: f32[4,1,32], index: 7, kind: input, shape index: {}]   ;;  %s3364_s8 = inlined_call_operand.vmem [shape: f32[4,1,32], index: 8, kind: input, shape index: {}]   ;;  %s3365_s9 = inlined_call_operand.vmem [shape: f32[4,1,32], index: 9, kind: input, shape index: {}]   ;;  %s3366_s10 = inlined_call_operand.vmem [shape: bf16[4,32,128], index: 10, kind: input, shape index: {}]   ;;  %s3367_s11 = inlined_call_operand.vmem [shape: f32[4,1,128], index: 11, kind: input, shape index: {}]   ;;  %s3368_s12 = inlined_call_operand.vmem [shape: bf16[4,128,32], index: 12, kind: input, shape index: {}]   ;;  %s3369_s13 = inlined_call_operand.vmem [shape: f32[4,1,32], index: 13, kind: input, shape index: {}]   ;;  %s3370_s14 = inlined_call_operand.vmem [shape: bf16[4,32,32], index: 14, kind: input, shape index: {}]   ;;  %s3371_s15 = inlined_call_operand.vmem [shape: f32[4,1,32], index: 15, kind: input, shape index: {}]   ;;  %s3372_s16 = inlined_call_operand.vmem [shape: f32[32,64], index: 16, kind: input, shape index: {}]   ;;  %s3373_s17 = inlined_call_operand.vmem [shape: f32[1,64], index: 17, kind: input, shape index: {}]   ;;  %s3374_s18 = inlined_call_operand.vmem [shape: f32[32,32], index: 18, kind: input, shape index: {}]   ;;  %s3375_s19 = inlined_call_operand.vmem [shape: f32[1,32], index: 19, kind: input, shape index: {}]   ;;  %s3376_s20 = inlined_call_operand.hbm [shape: f32[2,1,64], index: 20, kind: output, shape index: {0}]   ;;  %s3377_s21 = inlined_call_operand.hbm [shape: f32[2,1,32], index: 21, kind: output, shape index: {1}]  }
   0x1   :  { %3387 = sst [smem:[#allocation14_spill]] %s3356_s0 }
   0x2   :  { %3388 = sst [smem:[#allocation15_spill]] %s3357_s1 }
   0x3   :  { %3389 = sst [smem:[#allocation16_spill]] %s3358_s2 }
   0x4   :  { %3390 = sst [smem:[#allocation17_spill]] %s3359_s3 }
   0x5   :  { %3391 = sst [smem:[#allocation18_spill]] %s3360_s4 }
   0x6   :  { %3392 = sst [smem:[#allocation19_spill]] %s3361_s5 }
   0x7   :  { %3393 = sst [smem:[#allocation20_spill]] %s3371_s15 }
   0x8   :  { %3394 = sst [smem:[#allocation21_spill]] %s3372_s16 }
   0x9   :  { %3395 = sst [smem:[#allocation22_spill]] %s3373_s17 }
   0xa   :  { %3396 = sst [smem:[#allocation23_spill]] %s3374_s18 }
   0xb   :  { %3397 = sst [smem:[#allocation24_spill]] %s3375_s19 }
   0xc   :  { %3398 = sst [smem:[#allocation25_spill]] %s3376_s20 }
   0xd   :  { %3399 = sst [smem:[#allocation26_spill]] %s3377_s21 }
   0xe   :  { %27 = vsyncpa [#allocation5], 0 }
   0xf   :  { %28 = vsyncpa [#allocation7], 0  ;;  %s2959_s2 = smov 0   ;;  %s2961_s25 = smov 0  }
  0x10   :  { %s2963_s26 = smov 0  }
  0x11 LB: > { %3400 = sst [smem:[#allocation10_spill]] %s2823_s2  ;;  %s43_s3 = sadd.s32 1, %s2827_s25  ;;  %s2831_s26 = sphi %s2963_s26, %s34_s26   ;;  %s2827_s25 = sphi %s2961_s25, %s3436_s25   ;;  %s2823_s2 = sphi %s2959_s2, %s3435_s2  }
  0x12   : > { %3401 = sst [smem:[#allocation11_spill]] %s2827_s25  ;;  %p44_p0 = scmp.ge.s32.totalorder %s43_s3, 4 }
  0x13   : > { %3402 = sst [smem:[#allocation12_spill]] %s2831_s26  ;;  %p2400_p1 = scmp.ge.s32.totalorder %s2831_s26, 1 }
  0x14   : > { %p737_p2 = scmp.lt.s32.totalorder %s2831_s26, 5  ;;  %s3438_s3 = smov (%p44_p0, %s43_s3), 0 }
  0x15   : > { %3403 = sst [smem:[#allocation13_spill]] %s3438_s3 }
  0x16   : > { %p738_p3 = pnand %p2400_p1, %p737_p2 }
  0x17   : > { %p859_p4 = scmp.lt.s32.totalorder (!%p738_p3), %s2823_s2, 3  ;;  %s3405_s1 = sld [smem:[#allocation16_spill]] (!%p738_p3) }
  0x18   : > { %741 = sbr.rel (%p738_p3) target bundleno = 3624 (0xe28), region = 100  ;;  %s3406_s25 = sld [smem:[#allocation18_spill]] (!%p738_p3) }
  0x19   : > { %s3409_s16 = sld [smem:[#allocation10_spill]] (!%p738_p3) }
  0x1f   : > { %s2982_s28 = scalar_select %p859_p4, %s2823_s2, 3 }
  0x20   : > { %s3408_s2 = sld [smem:[#allocation20_spill]]  ;;  %p2411_p5 = scmp.ne.s32.totalorder %s3409_s16, 0 }
  0x21   : > { %s2464_s29 = sshll.u32 %s2982_s28, 4  ;;  %s2467_s26 = sshll.u32 %s2982_s28, 6  ;;  %vm920_vm0 = vcmask (!%p2411_p5), 261120   ;;  %vm923_vm1 = vcmask (!%p2411_p5), 254976   ;;  %v2833_v2 = vmov (!%p2411_p5), 0.0  }
  0x22   : > { %s863_s24 = scalar_lea.vmem %s3405_s1, %s2464_s29  ;;  %s2995_s21 = scalar_lea.vmem %s3406_s25, %s2464_s29  ;;  %924 = vst.msk [vmem:[#allocation3] sm:$0x3] (!%p2411_p5), %vm923_vm1, %v2833_v2 }
  0x23   : > { %s3020_s19 = scalar_lea.vmem %s3366_s10, %s2464_s29  ;;  %s3030_s4 = scalar_lea.vmem %s3368_s12, %s2467_s26 }
  0x24   : > { %s902_s1 = scalar_lea.vmem %s3369_s13, %s2982_s28  ;;  %s3039_s5 = scalar_lea.vmem %s3370_s14, %s2464_s29 }
  0x25   : > { %917 = sbr.rel (%p2411_p5) target bundleno = 46 (0x2e), region = 104  ;;  %s3410_s26 = sld [smem:[#allocation14_spill]] (!%p2411_p5) }
  0x26   : > { %s910_s20 = scalar_lea.vmem %s3408_s2, %s2982_s28 }
  0x2b   : > { %s3411_s0 = smov (!%p2411_p5), %s3410_s26  ;;  %v918_v0 = vld [vmem:[%s3410_s26] sm:$0xff] (!%p2411_p5) }
  0x2c   : > { %v919_v1 = vld [vmem:[%s3411_s0 + $0x8] sm:$0xff]  ;;  %921 = vst.msk [vmem:[#allocation2] sm:$0xff] %vm920_vm0, %v918_v0 }
  0x2d   : > { %922 = vst.msk [vmem:[#allocation2 + $0x8] sm:$0xff] %vm920_vm0, %v919_v1 }
  0x2e PF: > { %v2709_v3 = vld [vmem:[%s863_s24] sm:$0xff]   ;;  %v2834_v4 = vmov 0.0   ;;  %v2710_v5 = vld [vmem:[%s863_s24 + $0x8] sm:$0xff]   ;;  %vm2835_vm2 = vmmov 0   ;;  %vm953_vm3 = vcmask 261120   ;;  %s3412_s29 = sld [smem:[#allocation17_spill]]  ;;  %s3417_s25 = scalar_lea.vmem %s3362_s6, %s2982_s28 }
  0x2f   : > { %2518 = vmatprep.subr.bf16.mxu0 %v2834_v4  ;;  %2538 = vmatprep.subr.bf16.mxu1 %v2834_v4  ;;  %s2836_s23 = smov 96   ;;  %vm1006_vm4 = vcmask 130048   ;;  %s3414_s22 = sld [smem:[#allocation15_spill]]  ;;  %vm1117_vm5 = vcmask 64512   ;;  %vm1147_vm6 = vcmask 1043456   ;;  %vm1846_vm7 = vcmask 1041409  }
  0x30   : > { %2519 = vmatpush3.bf16.msra.mxu0 %v2709_v3  ;;  %2522 = vmatprep.mubr.msk.bf16.mxu0 %vm2835_vm2, %v2834_v4  ;;  %s2837_s16 = smov 64   ;;  %s2838_s15 = smov 80   ;;  %vm1913_vm8 = vcmask 254976  }
  0x31   : > { %2520 = vmatprep.subr.bf16.mxu0 %v2834_v4  ;;  %2540 = vmatprep.mubr.msk.bf16.mxu1 %vm2835_vm2, %v2834_v4  ;;  %s2839_s26 = smov 112   ;;  %s2840_s30 = smov 48  }
  0x32   : > { %s2841_s17 = smov 16   ;;  %s3418_s3 = scalar_lea.vmem %s3363_s7, %s2982_s28 }
  0x33   : > { %s3420_s2 = scalar_lea.vmem %s3364_s8, %s2982_s28  ;;  %s3423_s18 = sld [smem:[#allocation10_spill]] }
  0x34   : > { %v3058_v7 = vld [vmem:[#allocation2 + $0x8] sm:$0xff]  ;;  %2521 = vmatpush3.bf16.msra.mxu0 %v2710_v5  ;;  %s3413_s24 = scalar_lea.vmem %s3412_s29, %s2982_s28  ;;  %s3415_s29 = sld [smem:[#allocation19_spill]] }
  0x35   : > { %v3056_v6 = vld [vmem:[#allocation2] sm:$0xff]  ;;  %2526 = vmatprep.subr.bf16.mxu0 %v2834_v4 }
  0x36   : > { %v927_v8 = vpack.c.bf16 %v3058_v7, %v3056_v6  ;;  %v2412_v9 = vld [vmem:[%s3413_s24] ss:$0 sm:$0xff]  ;;  %v3102_v31 = vld [vmem:[%s3414_s22 + $0x1] ss:$0 sm:$0xff] }
  0x37   : > { %v3095_v23 = vld [vmem:[%s3414_s22] ss:$0 sm:$0xff] }
  0x38   : > { %2523 = vmatmul.mubr.msk.bf16.vlgmr.msra.gmra.mrb[0].mxu0 %vm953_vm3, %v927_v8 }
  0x39   : > { %2528 = vmatprep.mubr.msk.bf16.mxu0 %vm2835_vm2, %v2834_v4  ;;  %p2453_p6 = scmp.ne.s32.totalorder %s3423_s18, 3 }
  0x3a   : > { %s3416_s24 = scalar_lea.vmem %s3415_s29, %s2982_s28  ;;  %vm2843_vm9 = vmmov (!%p2453_p6), 0   ;;  %vm2032_vm10 = vcmask (!%p2453_p6), 516096   ;;  %vm2145_vm11 = vcmask (!%p2453_p6), 253952  }
 0x10b   : > { %v991_v10 = vpop.f32.mrb[0].mxu0 }
 0x10c   : > { %v992_v11 = vadd.f32 %v2412_v9, %v991_v10  ;;  %v2524_v12 = vpop.f32.mrb[1].mxu0 }
 0x10d   : > { %v994_v13 = vpop.f32.mrb[2].mxu0 }
 0x10e   : > { %v3074_v14 = vpack.c.bf16 %v992_v11, %v992_v11  ;;  %v995_v15 = vadd.f32 %v2412_v9, %v994_v13  ;;  %v2525_v16 = vpop.f32.mrb[3].mxu0 }
 0x110   : > { %1004 = vrot.lane.b32.xlu0 %v3074_v14, %s2836_s23  ;;  %v3077_v17 = vpack.c.bf16 %v995_v15, %v995_v15 }
 0x114   : > { %1053 = vrot.lane.b32.xlu0 %v3077_v17, %s2836_s23 }
 0x182   : > { %v1005_v18 = vpop.permute.xlu0 %1004 }
 0x183   : > { %v1011_v19 = vsel %vm1006_vm4, %v1005_v18, 0 }
 0x184   : > { %2527 = vmatpush3.bf16.xpose.msra.mxu0 %v1011_v19 }
 0x185   : > { %2532 = vmatprep.subr.bf16.mxu0 %v2834_v4 }
 0x186   : > { %v1054_v20 = vpop.permute.xlu0 %1053 }
 0x187   : > { %v1059_v21 = vsel %vm1006_vm4, %v1054_v20, 0 }
 0x18b   : > { %2529 = vmatmul.mubr.msk.bf16.vlgmr.msra.gmra.mrb[4].mxu0 %vm1006_vm4, %v3074_v14 }
 0x18c   : > { %2533 = vmatpush3.bf16.xpose.msra.mxu0 %v1059_v21  ;;  %2534 = vmatprep.mubr.msk.bf16.mxu0 %vm2835_vm2, %v2834_v4 }
 0x18d   : > { %2544 = vmatprep.subr.bf16.mxu0 %v2834_v4 }
 0x193   : > { %2535 = vmatmul.mubr.msk.bf16.vlgmr.msra.gmra.mrb[8].mxu0 %vm1006_vm4, %v3077_v17 }
 0x194   : > { %2546 = vmatprep.mubr.msk.bf16.mxu0 %vm2835_vm2, %v2834_v4 }
 0x25e   : > { %v1047_v22 = vpop.f32.mrb[4].mxu0 }
 0x25f   : > { %v1101_v24 = vmul.f32 0.25, %v1047_v22  ;;  %v2530_v25 = vpop.f32.mrb[5].mxu0 }
 0x260   : > { %v1050_v26 = vpop.f32.mrb[6].mxu0 }
 0x261   : > { %v2531_v27 = vpop.f32.mrb[7].mxu0  ;;  %v1115_v28 = vadd.f32 %v3095_v23, %v1101_v24 }
 0x263   : > { %v1118_v29 = vsel %vm1117_vm5, %v1115_v28, -inf }
 0x264   : > { %1119 = vmax.xlane.f32.xlu1 %v1118_v29 }
 0x266   : > { %v1095_v30 = vpop.f32.mrb[8].mxu0 }
 0x267   : > { %v1102_v32 = vmul.f32 0.25, %v1095_v30  ;;  %v2536_v33 = vpop.f32.mrb[9].mxu0 }
 0x268   : > { %v1098_v34 = vpop.f32.mrb[10].mxu0 }
 0x269   : > { %v2537_v35 = vpop.f32.mrb[11].mxu0  ;;  %v1116_v36 = vadd.f32 %v3102_v31, %v1102_v32 }
 0x26b   : > { %v1121_v37 = vsel %vm1117_vm5, %v1116_v36, -inf }
 0x26c   : > { %1122 = vmax.xlane.f32.xlu1 %v1121_v37 }
 0x27d   : > { %1142 = vrot.lane.b32.xlu1 %v3074_v14, %s2837_s16 }
 0x281   : > { %1191 = vrot.lane.b32.xlu1 %v3077_v17, %s2837_s16  ;;  %s3424_s16 = sld [smem:[#allocation21_spill]] (!%p2453_p6) }
 0x285   : > { %1241 = vrot.lane.b32.xlu1 %v3074_v14, %s2838_s15 }
 0x2f1   : > { %v1120_v38 = vpop.xlane.xlu1 %1119 }
 0x2f2   : > { %v1124_v39 = vsub.f32 %v1115_v28, %v1120_v38 }
 0x2f4   : > { %v1126_v40 = vmul.f32 1.442695, %v1124_v39 }
 0x2f6   : > { %2725 = vpow2.f32 %v1126_v40 }
 0x2f9   : > { %v1123_v41 = vpop.xlane.xlu1 %1122 }
 0x2fa   : > { %v1125_v42 = vsub.f32 %v1116_v36, %v1123_v41 }
 0x2fc   : > { %v1128_v43 = vmul.f32 1.442695, %v1125_v42 }
 0x2fd   : > { %v1143_v44 = vpop.permute.xlu1 %1142 }
 0x2fe   : > { %2727 = vpow2.f32 %v1128_v43  ;;  %v1149_v45 = vsel %vm1147_vm6, %v1143_v44, 0 }
 0x2ff   : > { %2539 = vmatpush3.bf16.msra.mxu1 %v1149_v45 }
 0x300   : > { %v2726_v46 = vpop.eup %2725  ;;  %2550 = vmatprep.subr.bf16.mxu1 %v2834_v4 }
 0x301   : > { %v1192_v47 = vpop.permute.xlu1 %1191  ;;  %v1130_v48 = vsel %vm1117_vm5, %v2726_v46, 0.0 }
 0x302   : > { %v1197_v49 = vsel %vm1147_vm6, %v1192_v47, 0  ;;  %1131 = vadd.xlane.f32.xlu0 %v1130_v48 }
 0x303   : > { %2545 = vmatpush3.bf16.msra.mxu0 %v1197_v49  ;;  %v2711_v49 = vld [vmem:[%s2995_s21] sm:$0xff]  }
 0x304   : > { %2556 = vmatprep.subr.bf16.mxu0 %v2834_v4 }
 0x305   : > { %v1242_v53 = vpop.permute.xlu1 %1241 }
 0x306   : > { %v1247_v58 = vsel %vm1006_vm4, %v1242_v53, 0 }
 0x308   : > { %v2728_v50 = vpop.eup %2727 }
 0x309   : > { %v1133_v51 = vsel %vm1117_vm5, %v2728_v50, 0.0 }
 0x30a   : > { %1134 = vadd.xlane.f32.xlu1 %v1133_v51 }
 0x318   : > { %1239 = vrot.lane.b32.xlu0 %v3074_v14, %s2839_s26 }
 0x31b   : > { %1291 = vrot.lane.b32.xlu1 %v3077_v17, %s2838_s15 }
 0x31f   : > { %1289 = vrot.lane.b32.xlu1 %v3077_v17, %s2839_s26  ;;  %s3419_s26 = scalar_lea.vmem %s3367_s11, %s2982_s28 }
 0x38f   : > { %v1132_v52 = vpop.xlane.xlu0 %1131 }
 0x390   : > { %2729 = vrcp.f32 %v1132_v52 }
 0x393   : > { %v1240_v63 = vpop.permute.xlu0 %1239 }
 0x397   : > { %v1135_v54 = vpop.xlane.xlu1 %1134 }
 0x398   : > { %2731 = vrcp.f32 %v1135_v54 }
 0x39a   : > { %v2730_v55 = vpop.eup %2729 }
 0x39b   : > { %v1138_v56 = vmul.f32 %v2730_v55, %v2726_v46  ;;  %v1292_v61 = vpop.permute.xlu1 %1291 }
 0x39c   : > { %v1297_v0 = vsel %vm1006_vm4, %v1292_v61, 0 }
 0x39d   : > { %v1140_v57 = vpack.c.bf16 %v1138_v56, %v1138_v56 }
 0x39f   : > { %2541 = vmatmul.mubr.msk.bf16.vlgmr.msra.gmra.mrb[0].mxu1 %vm1117_vm5, %v1140_v57  ;;  %v1290_v1 = vpop.permute.xlu1 %1289 }
 0x3a0   : > { %2551 = vmatpush3.bf16.xpose.msra.mxu1 %v1247_v58  ;;  %2552 = vmatprep.mubr.msk.bf16.mxu1 %vm2835_vm2, %v2834_v4 }
 0x3a1   : > { %2562 = vmatprep.subr.bf16.mxu1 %v2834_v4 }
 0x3a2   : > { %v2732_v59 = vpop.eup %2731 }
 0x3a3   : > { %v1139_v60 = vmul.f32 %v2732_v59, %v2728_v50  ;;  %v2712_v50 = vld [vmem:[%s2995_s21 + $0x8] sm:$0xff]  }
 0x3a5   : > { %v1141_v62 = vpack.c.bf16 %v1139_v60, %v1139_v60 }
 0x3a7   : > { %2547 = vmatmul.mubr.msk.bf16.vlgmr.msra.gmra.mrb[12].mxu0 %vm1117_vm5, %v1141_v62  ;;  %2553 = vmatmul.mubr.msk.bf16.vlgmr.msra.gmra.mrb[4].mxu1 %vm1006_vm4, %v1240_v63 }
 0x3a8   : > { %2557 = vmatpush3.bf16.xpose.msra.mxu0 %v1297_v0  ;;  %2558 = vmatprep.mubr.msk.bf16.mxu0 %vm2835_vm2, %v2834_v4 }
 0x3a9   : > { %2568 = vmatprep.subr.bf16.mxu0 %v2834_v4  ;;  %2564 = vmatprep.mubr.msk.bf16.mxu1 %vm2835_vm2, %v2834_v4 }
 0x3af   : > { %2559 = vmatmul.mubr.msk.bf16.vlgmr.msra.gmra.mrb[16].mxu0 %vm1006_vm4, %v1290_v1 }
 0x3b0   : > { %2570 = vmatprep.mubr.msk.bf16.mxu0 %vm2835_vm2, %v2834_v4 }
 0x472   : > { %v3134_v2 = vpop.f32.mrb[0].mxu1 }
 0x473   : > { %v2542_v3 = vpop.f32.mrb[1].mxu1 }
 0x474   : > { %v1188_v5 = vpop.f32.mrb[2].mxu1  ;;  %v2428_v3 = vld [vmem:[%s3416_s24] ss:$0 sm:$0xff]  ;;  %s3421_s24 = scalar_lea.vmem %s3365_s9, %s2982_s28  ;;  %s3427_s28 = sld [smem:[#allocation24_spill]] (!%p2453_p6) }
 0x475   : > { %v2543_v8 = vpop.f32.mrb[3].mxu1 }
 0x47a   : > { %v3136_v9 = vpop.f32.mrb[12].mxu0  ;;  %v1283_v10 = vpop.f32.mrb[4].mxu1 }
 0x47b   : > { %v1339_v11 = vmul.f32 0.25, %v1283_v10  ;;  %v2548_v12 = vpop.f32.mrb[13].mxu0  ;;  %v2554_v13 = vpop.f32.mrb[5].mxu1 }
 0x47c   : > { %v1236_v15 = vpop.f32.mrb[14].mxu0  ;;  %v1286_v16 = vpop.f32.mrb[6].mxu1 }
 0x47d   : > { %v2549_v18 = vpop.f32.mrb[15].mxu0  ;;  %v2555_v19 = vpop.f32.mrb[7].mxu1  ;;  %v1341_v20 = vadd.f32 %v3095_v23, %v1339_v11 }
 0x47f   : > { %v1343_v21 = vsel %vm1117_vm5, %v1341_v20, -inf }
 0x480   : > { %1344 = vmax.xlane.f32.xlu1 %v1343_v21 }
 0x482   : > { %v1333_v22 = vpop.f32.mrb[16].mxu0 }
 0x483   : > { %v1340_v24 = vmul.f32 0.25, %v1333_v22  ;;  %v2560_v25 = vpop.f32.mrb[17].mxu0 }
 0x484   : > { %v1336_v26 = vpop.f32.mrb[18].mxu0 }
 0x485   : > { %v2561_v27 = vpop.f32.mrb[19].mxu0  ;;  %v1342_v28 = vadd.f32 %v3102_v31, %v1340_v24 }
 0x486   : > { %v2713_v27 = vld [vmem:[%s3020_s19] sm:$0xff]  }
 0x487   : > { %v1346_v29 = vsel %vm1117_vm5, %v1342_v28, -inf }
 0x488   : > { %1347 = vmax.xlane.f32.xlu0 %v1346_v29  ;;  %v2715_v29 = vld [vmem:[%s3030_s4] sm:$0xff]  }
 0x49e   : > { %1415 = vrot.lane.b32.xlu0 %v3077_v17, %s2840_s30 }
 0x50d   : > { %v1345_v30 = vpop.xlane.xlu1 %1344 }
 0x50e   : > { %v1349_v32 = vsub.f32 %v1341_v20, %v1345_v30  ;;  %v2716_v30 = vld [vmem:[%s3030_s4 + $0x8] sm:$0xff]  }
 0x510   : > { %v1351_v33 = vmul.f32 1.442695, %v1349_v32  ;;  %v2717_v32 = vld [vmem:[%s3030_s4 + $0x10] sm:$0xff]  }
 0x512   : > { %2733 = vpow2.f32 %v1351_v33  ;;  %v2718_v33 = vld [vmem:[%s3030_s4 + $0x18] sm:$0xff]  }
 0x515   : > { %v1348_v23 = vpop.xlane.xlu0 %1347 }
 0x516   : > { %v1350_v34 = vsub.f32 %v1342_v28, %v1348_v23  ;;  %v2714_v28 = vld [vmem:[%s3020_s19 + $0x8] sm:$0xff]   ;;  %v2719_v23 = vld [vmem:[%s3030_s4 + $0x20] sm:$0xff]  }
 0x518   : > { %v1353_v35 = vmul.f32 1.442695, %v1350_v34  ;;  %v2720_v34 = vld [vmem:[%s3030_s4 + $0x28] sm:$0xff]  }
 0x519   : > { %v1416_v36 = vpop.permute.xlu0 %1415 }
 0x51a   : > { %2735 = vpow2.f32 %v1353_v35  ;;  %v1421_v37 = vsel %vm1147_vm6, %v1416_v36, 0 }
 0x51b   : > { %2569 = vmatpush3.bf16.msra.mxu0 %v1421_v37 }
 0x51c   : > { %v2734_v38 = vpop.eup %2733  ;;  %2582 = vmatprep.subr.bf16.mxu0 %v2834_v4 }
 0x51d   : > { %v1355_v31 = vsel %vm1117_vm5, %v2734_v38, 0.0 }
 0x51e   : > { %1356 = vadd.xlane.f32.xlu1 %v1355_v31 }
 0x524   : > { %v2736_v39 = vpop.eup %2735 }
 0x525   : > { %v1358_v17 = vsel %vm1117_vm5, %v2736_v39, 0.0 }
 0x526   : > { %1359 = vadd.xlane.f32.xlu1 %v1358_v17 }
 0x537   : > { %1367 = vrot.lane.b32.xlu1 %v3074_v14, %s2840_s30  ;;  %s3425_s30 = sld [smem:[#allocation23_spill]] (!%p2453_p6) }
 0x5ab   : > { %v1357_v40 = vpop.xlane.xlu1 %1356 }
 0x5ac   : > { %2737 = vrcp.f32 %v1357_v40  ;;  %v2432_v40 = vld [vmem:[%s3417_s25] ss:$0 sm:$0xff] }
 0x5b3   : > { %v1360_v41 = vpop.xlane.xlu1 %1359 }
 0x5b4   : > { %2739 = vrcp.f32 %v1360_v41 }
 0x5b6   : > { %v2738_v42 = vpop.eup %2737 }
 0x5b7   : > { %v1363_v43 = vmul.f32 %v2738_v42, %v2734_v38  ;;  %v1368_v44 = vpop.permute.xlu1 %1367 }
 0x5b8   : > { %v1373_v45 = vsel %vm1147_vm6, %v1368_v44, 0 }
 0x5b9   : > { %2563 = vmatpush3.bf16.msra.mxu1 %v1373_v45  ;;  %v1365_v46 = vpack.c.bf16 %v1363_v43, %v1363_v43  ;;  %v2433_v45 = vld [vmem:[%s3418_s3] ss:$0 sm:$0xff]  ;;  %s3426_s3 = sld [smem:[#allocation22_spill]] (!%p2453_p6) }
 0x5ba   : > { %2574 = vmatprep.subr.bf16.mxu1 %v2834_v4 }
 0x5bc   : > { %2565 = vmatmul.mubr.msk.bf16.vlgmr.msra.gmra.mrb[8].mxu1 %vm1117_vm5, %v1365_v46 }
 0x5bd   : > { %2578 = vmatprep.mubr.msk.bf16.mxu1 %vm2835_vm2, %v2834_v4  ;;  %2575 = vmatpush3.bf16.msra.mxu1 %v2711_v49  ;;  %v2721_v49 = vld [vmem:[%s3030_s4 + $0x30] sm:$0xff]  }
 0x5be   : > { %v2740_v14 = vpop.eup %2739  ;;  %2576 = vmatprep.subr.bf16.mxu1 %v2834_v4 }
 0x5bf   : > { %v1364_v47 = vmul.f32 %v2740_v14, %v2736_v39 }
 0x5c1   : > { %v1366_v48 = vpack.c.bf16 %v1364_v47, %v1364_v47  ;;  %2577 = vmatpush3.bf16.msra.mxu1 %v2712_v50  ;;  %v2722_v50 = vld [vmem:[%s3030_s4 + $0x38] sm:$0xff]  }
 0x5c2   : > { %2590 = vmatprep.subr.bf16.mxu1 %v2834_v4 }
 0x5c3   : > { %2571 = vmatmul.mubr.msk.bf16.vlgmr.msra.gmra.mrb[20].mxu0 %vm1117_vm5, %v1366_v48 }
 0x5c4   : > { %2586 = vmatprep.mubr.msk.bf16.mxu0 %vm2835_vm2, %v2834_v4  ;;  %2583 = vmatpush3.bf16.msra.mxu0 %v2713_v27 }
 0x5c5   : > { %2584 = vmatprep.subr.bf16.mxu0 %v2834_v4 }
 0x5c8   : > { %2585 = vmatpush3.bf16.msra.mxu0 %v2714_v28 }
 0x5c9   : > { %2610 = vmatprep.subr.bf16.mxu0 %v2834_v4 }
 0x68f   : > { %v1409_v51 = vpop.f32.mrb[8].mxu1 }
 0x690   : > { %v2566_v52 = vpop.f32.mrb[9].mxu1 }
 0x691   : > { %v1412_v53 = vpop.f32.mrb[10].mxu1 }
 0x692   : > { %v2567_v54 = vpop.f32.mrb[11].mxu1 }
 0x696   : > { %v1457_v55 = vpop.f32.mrb[20].mxu0 }
 0x697   : > { %v2704_v56 = vpack.i.bf16 %v1457_v55, %v1409_v51  ;;  %v2572_v57 = vpop.f32.mrb[21].mxu0  ;;  %v2434_v51 = vld [vmem:[%s3419_s26] ss:$0 sm:$0xff] }
 0x698   : > { %v1460_v58 = vpop.f32.mrb[22].mxu0 }
 0x699   : > { %2705 = vrot.lane.b32.xlu1 %v2704_v56, %s2841_s17  ;;  %v2573_v59 = vpop.f32.mrb[23].mxu0 }
 0x70b   : > { %v2706_v60 = vpop.permute.xlu1 %2705 }
 0x70c   : > { %v2708_v61 = vunpack.i.h.bf16 %v2706_v60  ;;  %v2707_v62 = vunpack.i.l.bf16 %v2706_v60 }
 0x70e   : > { %v1472_v63 = vsel %vm1006_vm4, %v3136_v9, %v2708_v61  ;;  %v1471_v0 = vsel %vm1006_vm4, %v3134_v2, %v2707_v62  ;;  %v2438_v61 = vld [vmem:[%s902_s1] ss:$0 sm:$0xff] }
 0x70f   : > { %v1473_v1 = vpack.c.bf16 %v1472_v63, %v1471_v0 }
 0x711   : > { %2579 = vmatmul.mubr.msk.bf16.vlgmr.msra.gmra.mrb[12].mxu1 %vm953_vm3, %v1473_v1 }
 0x712   : > { %2606 = vmatprep.mubr.msk.bf16.mxu1 %vm2835_vm2, %v2834_v4  ;;  %2591 = vmatpush3.bf16.msra.mxu1 %v2715_v29 }
 0x713   : > { %2592 = vmatprep.subr.bf16.mxu1 %v2834_v4 }
 0x716   : > { %2593 = vmatpush3.bf16.msra.mxu1 %v2716_v30 }
 0x717   : > { %2594 = vmatprep.subr.bf16.mxu1 %v2834_v4 }
 0x71a   : > { %2595 = vmatpush3.bf16.msra.mxu1 %v2717_v32  ;;  %v2447_v32 = vld [vmem:[%s3420_s2] ss:$0 sm:$0xff] }
 0x71b   : > { %2596 = vmatprep.subr.bf16.mxu1 %v2834_v4 }
 0x71e   : > { %2597 = vmatpush3.bf16.msra.mxu1 %v2718_v33 }
 0x71f   : > { %2598 = vmatprep.subr.bf16.mxu1 %v2834_v4 }
 0x722   : > { %2599 = vmatpush3.bf16.msra.mxu1 %v2719_v23 }
 0x723   : > { %2600 = vmatprep.subr.bf16.mxu1 %v2834_v4 }
 0x726   : > { %2601 = vmatpush3.bf16.msra.mxu1 %v2720_v34 }
 0x727   : > { %2602 = vmatprep.subr.bf16.mxu1 %v2834_v4 }
 0x72a   : > { %2603 = vmatpush3.bf16.msra.mxu1 %v2721_v49 }
 0x72b   : > { %2604 = vmatprep.subr.bf16.mxu1 %v2834_v4 }
 0x72e   : > { %2605 = vmatpush3.bf16.msra.mxu1 %v2722_v50 }
 0x7e4   : > { %v1534_v5 = vpop.f32.mrb[12].mxu1 }
 0x7e5   : > { %v1535_v8 = vadd.f32 %v2428_v3, %v1534_v5  ;;  %v2580_v10 = vpop.f32.mrb[13].mxu1 }
 0x7e6   : > { %v1537_v11 = vpop.f32.mrb[14].mxu1 }
 0x7e7   : > { %v1538_v12 = vadd.f32 %v2428_v3, %v1537_v11  ;;  %v2581_v9 = vpop.f32.mrb[15].mxu1  ;;  %v1541_v13 = vadd.f32 %v1535_v8, %v3056_v6 }
 0x7e9   : > { %v1545_v2 = vsel %vm953_vm3, %v1541_v13, 0.0  ;;  %v1542_v15 = vadd.f32 %v1538_v12, %v3058_v7 }
 0x7ea   : > { %1546 = vadd.xlane.f32.xlu1 %v1545_v2 }
 0x7eb   : > { %v1548_v16 = vsel %vm953_vm3, %v1542_v15, 0.0 }
 0x7ec   : > { %1549 = vadd.xlane.f32.xlu0 %v1548_v16 }
 0x877   : > { %v1547_v18 = vpop.xlane.xlu1 %1546 }
 0x878   : > { %v1552_v19 = vmul.f32 0.03125, %v1547_v18 }
 0x879   : > { %v1550_v20 = vpop.xlane.xlu0 %1549 }
 0x87a   : > { %v1554_v21 = vsub.f32 %v1541_v13, %v1552_v19  ;;  %v1553_v22 = vmul.f32 0.03125, %v1550_v20 }
 0x87c   : > { %v1555_v24 = vsub.f32 %v1542_v15, %v1553_v22  ;;  %v1556_v25 = vmul.f32 %v1554_v21, %v1554_v21 }
 0x87e   : > { %v1558_v6 = vsel %vm953_vm3, %v1556_v25, 0.0  ;;  %v1557_v26 = vmul.f32 %v1555_v24, %v1555_v24  ;;  %v2724_v25 = vld [vmem:[%s3039_s5 + $0x8] sm:$0xff]  }
 0x87f   : > { %1559 = vadd.xlane.f32.xlu0 %v1558_v6 }
 0x880   : > { %v1561_v7 = vsel %vm953_vm3, %v1557_v26, 0.0 }
 0x881   : > { %1562 = vadd.xlane.f32.xlu1 %v1561_v7 }
 0x90c   : > { %v1560_v35 = vpop.xlane.xlu0 %1559 }
 0x90d   : > { %v1564_v36 = vmul.f32 0.03125, %v1560_v35 }
 0x90e   : > { %v1563_v37 = vpop.xlane.xlu1 %1562 }
 0x90f   : > { %v1566_v38 = vadd.f32 1e-05, %v1564_v36  ;;  %v1565_v31 = vmul.f32 0.03125, %v1563_v37 }
 0x911   : > { %2741 = vrsqrt.f32 %v1566_v38  ;;  %v1567_v39 = vadd.f32 1e-05, %v1565_v31 }
 0x913   : > { %2743 = vrsqrt.f32 %v1567_v39 }
 0x91b   : > { %v2742_v17 = vpop.eup %2741 }
 0x91c   : > { %v1570_v41 = vmul.f32 %v2742_v17, %v1554_v21 }
 0x91d   : > { %v2744_v42 = vpop.eup %2743 }
 0x91e   : > { %v1578_v43 = vmul.f32 %v2432_v40, %v1570_v41  ;;  %v1571_v44 = vmul.f32 %v2744_v42, %v1555_v24  ;;  %v2723_v24 = vld [vmem:[%s3039_s5] sm:$0xff]  }
 0x920   : > { %v1579_v46 = vmul.f32 %v2432_v40, %v1571_v44  ;;  %v1586_v14 = vadd.f32 %v2433_v45, %v1578_v43 }
 0x922   : > { %v1587_v47 = vadd.f32 %v2433_v45, %v1579_v46 }
 0x924   : > { %v1588_v48 = vpack.c.bf16 %v1587_v47, %v1586_v14 }
 0x926   : > { %2587 = vmatmul.mubr.msk.bf16.vlgmr.msra.gmra.mrb[24].mxu0 %vm953_vm3, %v1588_v48 }
 0x927   : > { %2614 = vmatprep.mubr.msk.bf16.mxu0 %vm2835_vm2, %v2834_v4  ;;  %2611 = vmatpush3.bf16.msra.mxu0 %v2723_v24 }
 0x928   : > { %2612 = vmatprep.subr.bf16.mxu0 %v2834_v4  ;;  %v2448_v4 = vld [vmem:[%s3421_s24] ss:$0 sm:$0xff] }
 0x92b   : > { %2613 = vmatpush3.bf16.msra.mxu0 %v2724_v25 }
 0x9f9   : > { %v1649_v52 = vpop.f32.mrb[24].mxu0 }
 0x9fa   : > { %v1650_v53 = vadd.f32 %v2434_v51, %v1649_v52  ;;  %v2588_v54 = vpop.f32.mrb[25].mxu0 }
 0x9fb   : > { %v1652_v55 = vpop.f32.mrb[26].mxu0 }
 0x9fc   : > { %v1653_v56 = vadd.f32 %v2434_v51, %v1652_v55  ;;  %v2589_v57 = vpop.f32.mrb[27].mxu0  ;;  %v1656_v58 = vmax.f32 %v1650_v53, 0.0 }
 0x9fe   : > { %v1657_v59 = vmax.f32 %v1653_v56, 0.0 }
 0xa00   : > { %v1658_v60 = vpack.c.bf16 %v1657_v59, %v1656_v58  ;;  %v1835_v58 = vld [vmem:[#allocation3] sm:$0x3] }
 0xa02   : > { %2607 = vmatmul.mubr.bf16.vlgmr.msra.gmra.mrb[16].mxu1 %v1658_v60  ;;  %v2452_v60 = vld [vmem:[%s910_s20] ss:$0 sm:$0xff] }
 0xad5   : > { %v1764_v62 = vpop.f32.mrb[16].mxu1 }
 0xad6   : > { %v1765_v63 = vadd.f32 %v2438_v61, %v1764_v62  ;;  %v2608_v0 = vpop.f32.mrb[17].mxu1 }
 0xad7   : > { %v1767_v1 = vpop.f32.mrb[18].mxu1 }
 0xad8   : > { %v1768_v3 = vadd.f32 %v2438_v61, %v1767_v1  ;;  %v2609_v5 = vpop.f32.mrb[19].mxu1  ;;  %v1771_v8 = vadd.f32 %v1765_v63, %v1586_v14 }
 0xad9   : > { %v1920_v5 = vld [vmem:[%s3424_s16 + $0x8] sm:$0xff] (!%p2453_p6) }
 0xada   : > { %v1775_v10 = vsel %vm953_vm3, %v1771_v8, 0.0  ;;  %v1772_v11 = vadd.f32 %v1768_v3, %v1587_v47  ;;  %v1919_v3 = vld [vmem:[%s3424_s16] sm:$0xff] (!%p2453_p6) }
 0xadb   : > { %1776 = vadd.xlane.f32.xlu0 %v1775_v10  ;;  %v2842_v10 = vmov (!%p2453_p6), 0.0|0.0  }
 0xadc   : > { %v1778_v12 = vsel %vm953_vm3, %v1772_v11, 0.0  ;;  %2640 = vmatprep.subr.bf16.mxu0 (!%p2453_p6), %v2842_v10  ;;  %2646 = vmatprep.subr.bf16.mxu1 (!%p2453_p6), %v2842_v10 }
 0xadd   : > { %1779 = vadd.xlane.f32.xlu1 %v1778_v12  ;;  %v2037_v12 = vld [vmem:[%s3425_s30 + $0x8] sm:$0xff] (!%p2453_p6) }
 0xb68   : > { %v1777_v9 = vpop.xlane.xlu0 %1776 }
 0xb69   : > { %v1781_v13 = vmul.f32 0.03125, %v1777_v9  ;;  %v1921_v9 = vld [vmem:[%s3424_s16 + $0x10] sm:$0xff] (!%p2453_p6) }
 0xb6a   : > { %v1780_v2 = vpop.xlane.xlu1 %1779 }
 0xb6b   : > { %v1783_v15 = vsub.f32 %v1771_v8, %v1781_v13  ;;  %v1782_v16 = vmul.f32 0.03125, %v1780_v2  ;;  %v2036_v8 = vld [vmem:[%s3425_s30] sm:$0xff] (!%p2453_p6)  ;;  %v1922_v13 = vld [vmem:[%s3424_s16 + $0x18] sm:$0xff] (!%p2453_p6) }
 0xb6c   : > { %v2647_v2 = vpack.c.bf16 (!%p2453_p6), %v2037_v12, %v2036_v8 }
 0xb6d   : > { %v1784_v18 = vsub.f32 %v1772_v11, %v1782_v16  ;;  %v1785_v19 = vmul.f32 %v1783_v15, %v1783_v15  ;;  %v2641_v11 = vpack.c.bf16 (!%p2453_p6), %v1920_v5, %v1919_v3  ;;  %v2039_v16 = vld [vmem:[%s3425_s30 + $0x18] sm:$0xff] (!%p2453_p6) }
 0xb6e   : > { %2648 = vmatpush3.bf16.msra.mxu1 (!%p2453_p6), %v2647_v2 }
 0xb6f   : > { %v1787_v20 = vsel %vm953_vm3, %v1785_v19, 0.0  ;;  %v1786_v21 = vmul.f32 %v1784_v18, %v1784_v18  ;;  %v2644_v19 = vpack.c.bf16 (!%p2453_p6), %v1922_v13, %v1921_v9  ;;  %2649 = vmatprep.subr.bf16.mxu1 (!%p2453_p6), %v2842_v10 }
 0xb70   : > { %1788 = vadd.xlane.f32.xlu0 %v1787_v20 }
 0xb71   : > { %v1790_v22 = vsel %vm953_vm3, %v1786_v21, 0.0 }
 0xb72   : > { %1791 = vadd.xlane.f32.xlu1 %v1790_v22 }
 0xbfd   : > { %v1789_v6 = vpop.xlane.xlu0 %1788 }
 0xbfe   : > { %v1793_v26 = vmul.f32 0.03125, %v1789_v6  ;;  %v2845_v6 = vmov (!%p2453_p6), 1966171168  }
 0xbff   : > { %v1792_v7 = vpop.xlane.xlu1 %1791 }
 0xc00   : > { %v1795_v27 = vadd.f32 1e-05, %v1793_v26  ;;  %v1794_v28 = vmul.f32 0.03125, %v1792_v7  ;;  %v2009_v26 = vunpack.c.l.s4 (!%p2453_p6), %v2845_v6  ;;  %v2011_v7 = vlaneseq (!%p2453_p6) }
 0xc02   : > { %2745 = vrsqrt.f32 %v1795_v27  ;;  %v1796_v29 = vadd.f32 1e-05, %v1794_v28  ;;  %v2010_v27 = vunpack.c.0.s8 (!%p2453_p6), %v2009_v26  ;;  %v2012_v28 = vshrl.u32 (!%p2453_p6), %v2011_v7, 7 }
 0xc04   : > { %2747 = vrsqrt.f32 %v1796_v29  ;;  %v2454_v29 = vld [vmem:[%s3426_s3] ss:$0 sm:$0xff] (!%p2453_p6) }
 0xc0c   : > { %v2746_v30 = vpop.eup %2745 }
 0xc0d   : > { %v1799_v33 = vmul.f32 %v2746_v30, %v1783_v15  ;;  %v2038_v15 = vld [vmem:[%s3425_s30 + $0x10] sm:$0xff] (!%p2453_p6)  ;;  %v2013_v30 = vsub.s32 (!%p2453_p6), %v2010_v27, %v2012_v28 }
 0xc0e   : > { %v2748_v23 = vpop.eup %2747  ;;  %v2650_v22 = vpack.c.bf16 (!%p2453_p6), %v2039_v16, %v2038_v15 }
 0xc0f   : > { %v1807_v34 = vmul.f32 %v2447_v32, %v1799_v33  ;;  %v1800_v35 = vmul.f32 %v2748_v23, %v1784_v18  ;;  %v2844_v18 = vmov (!%p2453_p6), 0.0  }
 0xc10   : > { %2637 = vmatprep.mubr.msk.f32.mxu1 (!%p2453_p6), %vm2843_vm9, %v2844_v18  ;;  %2651 = vmatpush3.bf16.msra.mxu1 (!%p2453_p6), %v2650_v22 }
 0xc11   : > { %v3238_v36 = vadd.f32 %v2448_v4, %v1807_v34  ;;  %v1808_v37 = vmul.f32 %v2447_v32, %v1800_v35  ;;  %v2456_v32 = vld [vmem:[%s3427_s28] ss:$0 sm:$0xff] (!%p2453_p6) }
 0xc13   : > { %1817 = vst.msk [vmem:[#allocation2] sm:$0xff] %vm953_vm3, %v3238_v36  ;;  %v1819_v38 = vsel %vm953_vm3, %v3238_v36, 0.0  ;;  %v3244_v31 = vadd.f32 %v2448_v4, %v1808_v37  ;;  %v1932_v20 = vrot.slane (!%p2453_p6), %v3238_v36, 7 }
 0xc14   : > { %v1820_v39 = vrot.slane %v1819_v38, 4 }
 0xc15   : > { %1818 = vst.msk [vmem:[#allocation2 + $0x8] sm:$0xff] %vm953_vm3, %v3244_v31  ;;  %v1826_v17 = vsel %vm953_vm3, %v3244_v31, 0.0  ;;  %v1933_v21 = vrot.slane (!%p2453_p6), %v3244_v31, 6 }
 0xc16   : > { %v1821_v40 = vadd.f32 %v1820_v39, %v1819_v38  ;;  %v1827_v41 = vrot.slane %v1826_v17, 4 }
 0xc17   : > { %v1934_v24 = vsel (!%p2453_p6), %vm1846_vm7, %v1933_v21, %v1932_v20 }
 0xc18   : > { %v1822_v42 = vrot.slane %v1821_v40, 2  ;;  %v1828_v43 = vadd.f32 %v1827_v41, %v1826_v17 }
 0xc1a   : > { %v1829_v44 = vrot.slane %v1828_v43, 2  ;;  %v1823_v45 = vadd.f32 %v1822_v42, %v1821_v40 }
 0xc1c   : > { %v1824_v46 = vrot.slane %v1823_v45, 1  ;;  %v1830_v14 = vadd.f32 %v1829_v44, %v1828_v43 }
 0xc1e   : > { %v1825_v47 = vadd.f32 %v1824_v46, %v1823_v45  ;;  %v1831_v48 = vrot.slane %v1830_v14, 1 }
 0xc20   : > { %v1832_v49 = vadd.f32 %v1831_v48, %v1830_v14  ;;  %v1833_v50 = vmul.f32 0.125, %v1825_v47 }
 0xc22   : > { %v1834_v51 = vmul.f32 0.125, %v1832_v49  ;;  %v1836_v52 = vpack.c.bf16 %v1833_v50, %v1833_v50 }
 0xc24   : > { %v1837_v53 = vpack.c.bf16 %v1834_v51, %v1834_v51  ;;  %v1844_v54 = vunpack.c.l.b16 %v1836_v52 }
 0xc26   : > { %v1845_v55 = vunpack.c.l.b16 %v1837_v53 }
 0xc28   : > { %v1847_v56 = vsel %vm1846_vm7, %v1845_v55, %v1844_v54 }
 0xc29   : > { %v1848_v57 = vpack.c.b16 %v1847_v56, %v1847_v56 }
 0xc2b   : > { %2615 = vmatmul.mubr.msk.bf16.vlgmr.msra.gmra.mrb[28].mxu0 %vm953_vm3, %v1848_v57 }
 0xc2c   : > { %2626 = vmatprep.mubr.msk.f32.mxu0 (!%p2453_p6), %vm2843_vm9, %v2844_v18  ;;  %2642 = vmatpush3.bf16.msra.mxu0 (!%p2453_p6), %v2641_v11 }
 0xc2d   : > { %2643 = vmatprep.subr.bf16.mxu0 (!%p2453_p6), %v2842_v10 }
 0xc30   : > { %2645 = vmatpush3.bf16.msra.mxu0 (!%p2453_p6), %v2644_v19 }
 0xc33   : > { %2627 = vmatmul.mubr.msk.f32.vlgmr.msra.gmra.mrb[0].mxu0 (!%p2453_p6), %vm953_vm3, %v1934_v24 }
 0xcfd   : > { %1918 = sbr.rel (%p2453_p6) target bundleno = 3560 (0xde8), region = 108 }
 0xcfe   : > { %v1898_v59 = vpop.f32.mrb[28].mxu0 }
 0xcff   : > { %v1904_v61 = vadd.f32 %v1898_v59, %v1835_v58  ;;  %v2616_v62 = vpop.f32.mrb[29].mxu0 }
 0xd00   : > { %v1901_v63 = vpop.f32.mrb[30].mxu0 }
 0xd01   : > { %v1912_v0 = vadd.f32 %v2452_v60, %v1904_v61  ;;  %v2617_v1 = vpop.f32.mrb[31].mxu0 }
 0xd03   : > { %1914 = vst.msk [vmem:[#allocation3] sm:$0x3] %vm1913_vm8, %v1912_v0 }
 0xd06   : > { %v2003_v33 = vpop.f32.mrb[0].mxu0 }
 0xd07   : > { %v2004_v23 = vadd.f32 %v2454_v29, %v2003_v33  ;;  %v2628_v34 = vpop.f32.mrb[1].mxu0 }
 0xd09   : > { %v2014_v37 = vrot.slane %v2004_v23, %v2013_v30 }
 0xd0a   : > { %v2035_v25 = vld [vmem:[#allocation3] sm:$0x3] }
 0xd0b   : > { %2638 = vmatmul.mubr.msk.f32.vlgmr.msra.gmra.mrb[0].mxu1 %vm953_vm3, %v2035_v25  ;;  %v2015_v31 = vcombine.high %v2014_v37, %v2014_v37  ;;  %v2022_v39 = vrot.slane %v2014_v37, %v2013_v30 }
 0xd0d   : > { %v2029_v41 = vrot.slane %v2015_v31, %v2013_v30  ;;  %2033 = vst.msk [vmem:[#allocation4] sm:$0x1] %vm2032_vm10, %v2022_v39 }
 0xd0f   : > { %2034 = vst.msk [vmem:[#allocation4 + $0x1] sm:$0x1] %vm2032_vm10, %v2029_v41 }
 0xdde   : > { %v2116_v4 = vpop.f32.mrb[0].mxu1 }
 0xddf   : > { %v2117_v35 = vadd.f32 %v2456_v32, %v2116_v4  ;;  %v2639_v36 = vpop.f32.mrb[1].mxu1 }
 0xde1   : > { %v2127_v38 = vrot.slane %v2117_v35, %v2013_v30 }
 0xde3   : > { %v2128_v17 = vcombine.high %v2127_v38, %v2127_v38  ;;  %v2135_v40 = vrot.slane %v2127_v38, %v2013_v30 }
 0xde5   : > { %v2142_v42 = vrot.slane %v2128_v17, %v2013_v30  ;;  %2146 = vst.msk [vmem:[#allocation6] sm:$0x1] %vm2145_vm11, %v2135_v40 }
 0xde7   : > { %2147 = vst.msk [vmem:[#allocation6 + $0x1] sm:$0x1] %vm2145_vm11, %v2142_v42 }
 0xde8 PF: > { %s3428_s20 = sld [smem:[#allocation12_spill]]  ;;  %s2846_s1 = smov [#allocation4]  }
 0xde9   : > { %s2157_s2 = sshll.u32 %s2846_s1, 4  ;;  %s2847_s5 = smov [#allocation6]   ;;  %s2158_s2 = int_to_ptr.vmem [resolvable:$true] %s2157_s2 }
 0xdea   : > { %s2173_s29 = sshll.u32 %s2847_s5, 4  ;;  %s2749_s24 = scalar_lea.vmem %s2158_s2, 32  ;;  %s2174_s29 = int_to_ptr.vmem [resolvable:$true] %s2173_s29 }
 0xdeb   : > { %p2750_p8 = scmp.ne.s32.totalorder %s2158_s2, %s2749_s24  ;;  %p2756_p11 = scmp.lt.s32.totalorder %s2158_s2, %s2158_s2 }
 0xdec   : > { %p2757_p12 = scmp.lt.s32.totalorder %s2749_s24, %s2749_s24 }
 0xdee   : > { %s3429_s21 = sadd.s32 4294967295, %s3428_s20   ;;  %p2758_p13 = por %p2757_p12, %p2756_p11 }
 0xdef   : > { %p3295_p7 = scmp.eq.s32.totalorder %s3429_s21, 3 }
 0xdf1   : > { %p2751_p9 = pnand %p2750_p8, %p3295_p7 }
 0xdf3   : > { %p2752_p10 = pneg %p2751_p9 }
 0xdf5   : > { %p2759_p0 = pnand %p2758_p13, %p2752_p10 }
 0xdf7   : > { %2762 = shalt.err (!%p2759_p0)
}
 0xdf8   : > { %s3431_s25 = sld [smem:[#allocation25_spill]] }
 0xdfe   : > { %s3432_s18 = smov %s3431_s25  ;;  %s2763_s27 = scalar_lea.hbm %s3431_s25, 32 }
 0xdff   : > { %p2764_p1 = scmp.ne.s32.totalorder %s3432_s18, %s2763_s27  ;;  %p2769_p4 = scmp.lt.u32.totalorder %s2763_s27, %s3432_s18 }
 0xe01   : > { %p2765_p2 = pnand %p2764_p1, %p3295_p7 }
 0xe03   : > { %p2766_p3 = pneg %p2765_p2 }
 0xe05   : > { %p2771_p5 = pnand %p2769_p4, %p2766_p3 }
 0xe07   : > { %2774 = shalt.err (!%p2771_p5)
}
 0xe08   : > { %s2848_s20 = smov 1   ;;  %s2775_s5 = scalar_lea.vmem %s2174_s29, 32 }
 0xe09   : > { %2653 = dma.vmem_to_hbm [thread:$0]  (%p3295_p7), %s2158_s2, 32, %s3432_s18, [#allocation5], %s2841_s17, %s2841_s17, %s2848_s20  }
 0xe0a   : > { %p2776_p6 = scmp.ne.s32.totalorder %s2174_s29, %s2775_s5  ;;  %p2782_p10 = scmp.lt.s32.totalorder %s2174_s29, %s2174_s29 }
 0xe0b   : > { %p2783_p11 = scmp.lt.s32.totalorder %s2775_s5, %s2775_s5 }
 0xe0c   : > { %p2777_p8 = pnand %p2776_p6, %p3295_p7 }
 0xe0d   : > { %p2784_p12 = por %p2783_p11, %p2782_p10 }
 0xe0e   : > { %p2778_p9 = pneg %p2777_p8 }
 0xe10   : > { %p2785_p13 = pnand %p2784_p12, %p2778_p9 }
 0xe12   : > { %2788 = shalt.err (!%p2785_p13)
}
 0xe13   : > { %s3433_s23 = sld [smem:[#allocation26_spill]] }
 0xe19   : > { %s2789_s25 = scalar_lea.hbm %s3433_s23, 32 }
 0xe1a   : > { %p2790_p0 = scmp.ne.s32.totalorder %s3433_s23, %s2789_s25  ;;  %p2795_p3 = scmp.lt.u32.totalorder %s2789_s25, %s3433_s23 }
 0xe1c   : > { %p2791_p1 = pnand %p2790_p0, %p3295_p7 }
 0xe1e   : > { %p2792_p2 = pneg %p2791_p1 }
 0xe20   : > { %p2797_p4 = pnand %p2795_p3, %p2792_p2 }
 0xe22   : > { %2800 = shalt.err (!%p2797_p4)
}
 0xe23   : > { %2655 = dma.vmem_to_hbm [thread:$0]  (%p3295_p7), %s2174_s29, 32, %s3433_s23, [#allocation7], %s2841_s17, %s2841_s17, %s2848_s20  }
 0xe24   : > { %2814 = dma.done.wait (%p3295_p7), [#allocation5], 32  }
 0xe25   : > { %2816 = vsyncadd (%p3295_p7), [#allocation5], 4294967264 }
 0xe26   : > { %2818 = dma.done.wait (%p3295_p7), [#allocation7], 32  }
 0xe27   : > { %2820 = vsyncadd (%p3295_p7), [#allocation7], 4294967264 }
 0xe28 PF: > { %s3434_s21 = sld [smem:[#allocation12_spill]]  ;;  %s3435_s2 = sld [smem:[#allocation11_spill]] }
 0xe29   : > { %s3436_s25 = sld [smem:[#allocation13_spill]] }
 0xe2e   : > { %s34_s26 = sadd.s32 1, %s3434_s21  }
 0xe2f   : > { %p31_p5 = scmp.ge.s32.totalorder %s34_s26, 6  }
 0xe31   :  { %33 = sbr.rel (!%p31_p5) target bundleno = 17 (0x11), region = 190 }
 0xe38   :  { %2193 = vsyncpa [#allocation5], 1 }
 0xe39   :  { %2195 = vsyncpa [#allocation5 + $0x1], 1 }
 0xe3a   :  { %2196 = vsyncpa [#allocation7], 1 }

</bundles_post_ra>
